<compile_context>
chip_gen: v7x
topology: tpu7x:2x2x1
jax: 0.10.0
libtpu: 0.0.40
codegen_flags: <defaults>
</compile_context>

<pallas_src>
import numpy as np
import jax
import jax.numpy as jnp
from jax.experimental import pallas as pl
from jax.experimental.pallas import tpu as pltpu

WIN = 11       # SSIM window size
SIGMA = 1.5    # Gaussian sigma
K1 = 0.01
K2 = 0.03


def _gaussian_1d(win=WIN, sigma=SIGMA):
    coords = np.arange(win, dtype=np.float64) - (win - 1) / 2.0
    g = np.exp(-(coords ** 2) / (2.0 * sigma ** 2))
    g = g / g.sum()
    return g.astype(np.float32)


def _toeplitz_factors(H, W):
    """grT (H, OH), gc (W, OW) such that (Gr @ A @ Gc) == valid Gaussian window sum.

    Column pass: A (H, W) @ gc -> (H, OW); row pass: transpose then @ grT -> (OW, OH).
    """
    g = _gaussian_1d()
    OH, OW = H - WIN + 1, W - WIN + 1
    grT = np.zeros((H, OH), np.float32)
    for o in range(OH):
        grT[o:o + WIN, o] = g
    gc = np.zeros((W, OW), np.float32)
    for q in range(OW):
        gc[q:q + WIN, q] = g
    return grT, gc


def _vmem_limit_bytes():
    """Generation-aware scoped-VMEM limit (v7x: 64 MiB/TC; v5e/v6e: 128 MiB)."""
    cap = None
    try:
        cap = int(pltpu.get_tpu_info().vmem_capacity_bytes)
    except Exception:
        cap = None
    if not cap or cap <= 0:
        cap = 64 * 1024 * 1024          # conservative default (v7x per-TC size)
    return min(int(0.75 * cap), 96 * 1024 * 1024)


def _choose_plane_batch(n, H, W, OH, OW, vmem_limit_bytes):
    """Plane batch P sized from the real per-step footprint, not the raw input block.

    Per plane: 2 inputs x 2 double-buffers x H*W*4 of DMA blocks plus the stacked
    intermediates (x2/y2/xy, the 5-way concat, both matmul passes and elementwise
    temps) -- roughly 28 plane-sized f32 arrays in total.
    """
    bytes_per_plane = 28 * H * W * 4
    const_bytes = 2 * 2 * (H * OH + W * OW) * 4   # double-buffered Toeplitz factors
    budget = int(0.60 * vmem_limit_bytes) - const_bytes
    p = max(1, budget // bytes_per_plane)
    p = min(p, n)
    # Keep at least 2 grid steps so v7x's two TensorCores both get work
    # (negligible cost on single-TC v5e/v6e).
    if n >= 2:
        p = min(p, -(-n // 2))
    return int(max(1, p))


def _make_ssim_kernel(P, H, W, data_range):
    OH = H - WIN + 1
    OW = W - WIN + 1
    c1 = np.float32((K1 * data_range) ** 2)
    c2 = np.float32((K2 * data_range) ** 2)

    def kernel(grT_ref, gc_ref, pred_ref, gt_ref, out_ref):
        x = pred_ref[...].astype(jnp.float32)   # (P, H, W)
        y = gt_ref[...].astype(jnp.float32)

        # Stack the five windowed quantities so both separable-window passes are
        # single large 2-D matmuls (collapsed M, no broadcast Toeplitz copies).
        s = jnp.concatenate([x, y, x * x, y * y, x * y], axis=0)      # (5P, H, W)

        # Column pass (contract W) on the MXU.
        # NOTE: default f32 matmul precision was validated against the numpy
        # reference at 2e-3; use lax.Precision.HIGHEST here if large data_range /
        # tighter tolerance is ever required (protects the variance cancellation).
        t = jnp.dot(s.reshape(5 * P * H, W), gc_ref[...],
                    preferred_element_type=jnp.float32)               # (5P*H, OW)
        t = t.reshape(5 * P, H, OW)

        # Row pass (contract H): minor-dims transpose (XLU) + one 2-D matmul.
        tt = jnp.swapaxes(t, 1, 2)                                     # (5P, OW, H)
        u = jnp.dot(tt.reshape(5 * P * OW, H), grT_ref[...],
                    preferred_element_type=jnp.float32)                # (5P*OW, OH)
        u = u.reshape(5 * P, OW, OH)    # per-plane window sums (transposed layout)

        mu_x = u[0 * P:1 * P]
        mu_y = u[1 * P:2 * P]
        exx = u[2 * P:3 * P]
        eyy = u[3 * P:4 * P]
        exy = u[4 * P:5 * P]

        mu_x2 = mu_x * mu_x
        mu_y2 = mu_y * mu_y
        mu_xy = mu_x * mu_y
        sig_x = exx - mu_x2
        sig_y = eyy - mu_y2
        sig_xy = exy - mu_xy

        num = (2.0 * mu_xy + c1) * (2.0 * sig_xy + c2)
        den = (mu_x2 + mu_y2 + c1) * (sig_x + sig_y + c2)
        # Divide via the otherwise idle EUP reciprocal slot.
        ssim_map = num * pl.reciprocal(den, approx=True)               # (P, OW, OH)

        # Per-grid-step partial sum; final mean + (1 - x) happen in JAX.
        s2 = jnp.sum(ssim_map, axis=0)                                 # (OW, OH)
        out_ref[0] = jnp.sum(s2, axis=(0, 1), keepdims=True)           # (1, 1)

    return kernel


def ssim_loss(pred, gt, data_range=1.0):
    """1 - SSIM(pred, gt); pred/gt are NCHW, returns a scalar float32."""
    assert pred.shape == gt.shape and pred.ndim == 4
    B, C, H, W = pred.shape
    assert H >= WIN and W >= WIN, "spatial dims must be >= SSIM window size"
    n = B * C
    OH = H - WIN + 1
    OW = W - WIN + 1

    vmem_limit = _vmem_limit_bytes()
    P = _choose_plane_batch(n, H, W, OH, OW, vmem_limit)
    nblk = -(-n // P)            # ceil
    pad = nblk * P - n

    p_ = pred.reshape(n, H, W)
    g_ = gt.reshape(n, H, W)
    if pad:
        z = jnp.zeros((pad, H, W), p_.dtype)
        p_ = jnp.concatenate([p_, z], axis=0)
        g_ = jnp.concatenate([g_, z], axis=0)

    grT_np, gc_np = _toeplitz_factors(H, W)
    grT = jnp.asarray(grT_np)    # (H, OH)
    gc = jnp.asarray(gc_np)      # (W, OW)

    kernel = _make_ssim_kernel(P, H, W, float(data_range))

    partials = pl.pallas_call(
        kernel,
        out_shape=jax.ShapeDtypeStruct((nblk, 1, 1), jnp.float32),
        grid_spec=pltpu.PrefetchScalarGridSpec(
            num_scalar_prefetch=0,
            grid=(nblk,),
            in_specs=[
                pl.BlockSpec((H, OH), lambda i: (0, 0)),        # Gr^T (constant)
                pl.BlockSpec((W, OW), lambda i: (0, 0)),        # Gc   (constant)
                pl.BlockSpec((P, H, W), lambda i: (i, 0, 0)),   # pred planes
                pl.BlockSpec((P, H, W), lambda i: (i, 0, 0)),   # gt planes
            ],
            out_specs=pl.BlockSpec((1, 1, 1), lambda i: (i, 0, 0)),
        ),
        compiler_params=pltpu.CompilerParams(
            dimension_semantics=("parallel",),
            vmem_limit_bytes=vmem_limit,
        ),
    )(grT, gc, p_, g_)

    total = jnp.sum(partials)
    if pad:
        # Zero pad planes have mu = sig = 0 -> SSIM == 1 for every window.
        total = total - np.float32(pad * OH * OW)
    mean_ssim = total / np.float32(n * OH * OW)
    return (1.0 - mean_ssim).astype(jnp.float32)


def _ssim_loss_ref_numpy(pred, gt, data_range=1.0):
    """Direct 121-tap numpy reference (valid Gaussian SSIM) for validation."""
    g1 = _gaussian_1d().astype(np.float64)
    w = np.outer(g1, g1)
    p = np.asarray(pred, np.float64)
    t = np.asarray(gt, np.float64)
    B, C, H, W = p.shape
    OH, OW = H - WIN + 1, W - WIN + 1
    c1 = (K1 * data_range) ** 2
    c2 = (K2 * data_range) ** 2

    def wconv(a):
        out = np.zeros(a.shape[:2] + (OH, OW), np.float64)
        for u in range(WIN):
            for v in range(WIN):
                out += w[u, v] * a[:, :, u:u + OH, v:v + OW]
        return out

    mu_x, mu_y = wconv(p), wconv(t)
    sig_x = wconv(p * p) - mu_x ** 2
    sig_y = wconv(t * t) - mu_y ** 2
    sig_xy = wconv(p * t) - mu_x * mu_y
    num = (2 * mu_x * mu_y + c1) * (2 * sig_xy + c2)
    den = (mu_x ** 2 + mu_y ** 2 + c1) * (sig_x + sig_y + c2)
    return 1.0 - (num / den).mean()


if __name__ == "__main__":
    key = jax.random.PRNGKey(0)
    k1, k2 = jax.random.split(key)
    # Small NCHW shapes consistent with an image-style loss.
    pred = jax.random.uniform(k1, (2, 4, 16, 16), dtype=jnp.float32)
    gt = jax.random.uniform(k2, (2, 4, 16, 16), dtype=jnp.float32)

    loss = ssim_loss(pred, gt, data_range=1.0)
    jax.block_until_ready(loss)

    ref = _ssim_loss_ref_numpy(np.asarray(pred), np.asarray(gt), data_range=1.0)
    np.testing.assert_allclose(float(loss), ref, rtol=2e-3, atol=2e-3)

    print("KERNEL_OK")
</pallas_src>

<mosaic_0001>
module attributes {stable_mosaic.version = 11 : i64} {
  func.func @kernel(%arg0: i32, %arg1: memref<16x6xf32, #tpu.memory_space<vmem>>, %arg2: memref<16x6xf32, #tpu.memory_space<vmem>>, %arg3: memref<4x16x16xf32, #tpu.memory_space<vmem>>, %arg4: memref<4x16x16xf32, #tpu.memory_space<vmem>>, %arg5: memref<1x1x1xf32, #tpu.memory_space<vmem>>) attributes {dimension_semantics = [#tpu.dimension_semantics<parallel>], iteration_bounds = array<i64: 2>, scalar_prefetch = 0 : i64, scratch_operands = 0 : i64, tpu.core_type = #tpu.core_type<tc>, window_params = [{pipeline_mode = #tpu.pipeline_mode<synchronous>, transform_indices = @transform_0, window_bounds = array<i64: 16, 6>}, {pipeline_mode = #tpu.pipeline_mode<synchronous>, transform_indices = @transform_1, window_bounds = array<i64: 16, 6>}, {transform_indices = @transform_2, window_bounds = array<i64: 4, 16, 16>}, {transform_indices = @transform_3, window_bounds = array<i64: 4, 16, 16>}, {transform_indices = @transform_4, window_bounds = array<i64: 1, 1, 1>}]} {
    %c0 = arith.constant 0 : index
    %c0_0 = arith.constant 0 : index
    %c0_1 = arith.constant 0 : index
    %0 = vector.load %arg3[%c0, %c0_0, %c0_1] : memref<4x16x16xf32, #tpu.memory_space<vmem>>, vector<4x16x16xf32>
    %c0_2 = arith.constant 0 : index
    %c0_3 = arith.constant 0 : index
    %c0_4 = arith.constant 0 : index
    %1 = vector.load %arg4[%c0_2, %c0_3, %c0_4] : memref<4x16x16xf32, #tpu.memory_space<vmem>>, vector<4x16x16xf32>
    %2 = arith.mulf %0, %0 : vector<4x16x16xf32>
    %3 = arith.mulf %1, %1 : vector<4x16x16xf32>
    %4 = arith.mulf %0, %1 : vector<4x16x16xf32>
    %5 = tpu.concatenate %0, %1, %2, %3, %4 in 0 : vector<4x16x16xf32>, vector<4x16x16xf32>, vector<4x16x16xf32>, vector<4x16x16xf32>, vector<4x16x16xf32> -> vector<20x16x16xf32>
    %6 = vector.shape_cast %5 : vector<20x16x16xf32> to vector<320x16xf32>
    %c0_5 = arith.constant 0 : index
    %c0_6 = arith.constant 0 : index
    %7 = vector.load %arg2[%c0_5, %c0_6] : memref<16x6xf32, #tpu.memory_space<vmem>>, vector<16x6xf32>
    %cst = arith.constant dense<0.000000e+00> : vector<320x6xf32>
    %8 = tpu.matmul %6, %7, %cst {dimension_numbers = #tpu.dot_dimension_numbers<[1], [0], [0], [1], [0, 0, 1, 1], [], []>} : vector<320x16xf32>, vector<16x6xf32>, vector<320x6xf32> -> vector<320x6xf32>
    %9 = vector.shape_cast %8 : vector<320x6xf32> to vector<20x16x6xf32>
    %10 = tpu.transpose %9, [0, 2, 1] : vector<20x16x6xf32> -> vector<20x6x16xf32>
    %11 = vector.shape_cast %10 : vector<20x6x16xf32> to vector<120x16xf32>
    %c0_7 = arith.constant 0 : index
    %c0_8 = arith.constant 0 : index
    %12 = vector.load %arg1[%c0_7, %c0_8] : memref<16x6xf32, #tpu.memory_space<vmem>>, vector<16x6xf32>
    %cst_9 = arith.constant dense<0.000000e+00> : vector<120x6xf32>
    %13 = tpu.matmul %11, %12, %cst_9 {dimension_numbers = #tpu.dot_dimension_numbers<[1], [0], [0], [1], [0, 0, 1, 1], [], []>} : vector<120x16xf32>, vector<16x6xf32>, vector<120x6xf32> -> vector<120x6xf32>
    %14 = vector.shape_cast %13 : vector<120x6xf32> to vector<20x6x6xf32>
    %15 = vector.extract_strided_slice %14 {offsets = [0, 0, 0], sizes = [4, 6, 6], strides = [1, 1, 1]} : vector<20x6x6xf32> to vector<4x6x6xf32>
    %16 = vector.extract_strided_slice %14 {offsets = [4, 0, 0], sizes = [4, 6, 6], strides = [1, 1, 1]} : vector<20x6x6xf32> to vector<4x6x6xf32>
    %17 = vector.extract_strided_slice %14 {offsets = [8, 0, 0], sizes = [4, 6, 6], strides = [1, 1, 1]} : vector<20x6x6xf32> to vector<4x6x6xf32>
    %18 = vector.extract_strided_slice %14 {offsets = [12, 0, 0], sizes = [4, 6, 6], strides = [1, 1, 1]} : vector<20x6x6xf32> to vector<4x6x6xf32>
    %19 = vector.extract_strided_slice %14 {offsets = [16, 0, 0], sizes = [4, 6, 6], strides = [1, 1, 1]} : vector<20x6x6xf32> to vector<4x6x6xf32>
    %20 = arith.mulf %15, %15 : vector<4x6x6xf32>
    %21 = arith.mulf %16, %16 : vector<4x6x6xf32>
    %22 = arith.mulf %15, %16 : vector<4x6x6xf32>
    %23 = arith.subf %17, %20 : vector<4x6x6xf32>
    %24 = arith.subf %18, %21 : vector<4x6x6xf32>
    %25 = arith.subf %19, %22 : vector<4x6x6xf32>
    %cst_10 = arith.constant 2.000000e+00 : f32
    %26 = vector.broadcast %cst_10 : f32 to vector<4x6x6xf32>
    %27 = arith.mulf %26, %22 : vector<4x6x6xf32>
    %cst_11 = arith.constant 9.99999974E-5 : f32
    %28 = vector.broadcast %cst_11 : f32 to vector<4x6x6xf32>
    %29 = arith.addf %27, %28 : vector<4x6x6xf32>
    %cst_12 = arith.constant 2.000000e+00 : f32
    %30 = vector.broadcast %cst_12 : f32 to vector<4x6x6xf32>
    %31 = arith.mulf %30, %25 : vector<4x6x6xf32>
    %cst_13 = arith.constant 8.99999984E-4 : f32
    %32 = vector.broadcast %cst_13 : f32 to vector<4x6x6xf32>
    %33 = arith.addf %31, %32 : vector<4x6x6xf32>
    %34 = arith.mulf %29, %33 : vector<4x6x6xf32>
    %35 = arith.addf %20, %21 : vector<4x6x6xf32>
    %cst_14 = arith.constant 9.99999974E-5 : f32
    %36 = vector.broadcast %cst_14 : f32 to vector<4x6x6xf32>
    %37 = arith.addf %35, %36 : vector<4x6x6xf32>
    %38 = arith.addf %23, %24 : vector<4x6x6xf32>
    %cst_15 = arith.constant 8.99999984E-4 : f32
    %39 = vector.broadcast %cst_15 : f32 to vector<4x6x6xf32>
    %40 = arith.addf %38, %39 : vector<4x6x6xf32>
    %41 = arith.mulf %37, %40 : vector<4x6x6xf32>
    %42 = tpu.reciprocal %41 {approx = true} : vector<4x6x6xf32> -> vector<4x6x6xf32>
    %43 = arith.mulf %34, %42 : vector<4x6x6xf32>
    %cst_16 = arith.constant dense<0.000000e+00> : vector<6x6xf32>
    %44 = vector.multi_reduction <add>, %43, %cst_16 [0] : vector<4x6x6xf32> to vector<6x6xf32>
    %45 = vector.shape_cast %44 : vector<6x6xf32> to vector<1x6x6xf32>
    %cst_17 = arith.constant dense<0.000000e+00> : vector<1xf32>
    %46 = vector.multi_reduction <add>, %45, %cst_17 [1, 2] : vector<1x6x6xf32> to vector<1xf32>
    %47 = vector.shape_cast %46 : vector<1xf32> to vector<1x1x1xf32>
    %48 = vector.extract %47[0, 0, 0] : f32 from vector<1x1x1xf32>
    %49 = vector.broadcast %48 : f32 to vector<1x1xf32>
    %c0_18 = arith.constant 0 : index
    %c0_19 = arith.constant 0 : index
    %c0_20 = arith.constant 0 : index
    %50 = vector.load %arg5[%c0_18, %c0_19, %c0_20] : memref<1x1x1xf32, #tpu.memory_space<vmem>>, vector<1x1x1xf32>
    %51 = vector.shape_cast %50 : vector<1x1x1xf32> to vector<1x1xf32>
    %52 = vector.shape_cast %49 : vector<1x1xf32> to vector<1x1x1xf32>
    tpu.vector_store %arg5[%c0_18, %c0_19, %c0_20], %52 {strides = array<i32>} : memref<1x1x1xf32, #tpu.memory_space<vmem>>, vector<1x1x1xf32>,
    return
  }
  func.func @transform_0(%arg0: i32) -> (i32, i32) {
    %c0_i32 = arith.constant 0 : i32
    %c0_i32_0 = arith.constant 0 : i32
    %c0_i32_1 = arith.constant 0 : i32
    return %c0_i32, %c0_i32_0 : i32, i32
  }
  func.func @transform_1(%arg0: i32) -> (i32, i32) {
    %c0_i32 = arith.constant 0 : i32
    %c0_i32_0 = arith.constant 0 : i32
    %c0_i32_1 = arith.constant 0 : i32
    return %c0_i32, %c0_i32_0 : i32, i32
  }
  func.func @transform_2(%arg0: i32) -> (i32, i32, i32) {
    %c0_i32 = arith.constant 0 : i32
    %c0_i32_0 = arith.constant 0 : i32
    %c0_i32_1 = arith.constant 0 : i32
    return %arg0, %c0_i32, %c0_i32_0 : i32, i32, i32
  }
  func.func @transform_3(%arg0: i32) -> (i32, i32, i32) {
    %c0_i32 = arith.constant 0 : i32
    %c0_i32_0 = arith.constant 0 : i32
    %c0_i32_1 = arith.constant 0 : i32
    return %arg0, %c0_i32, %c0_i32_0 : i32, i32, i32
  }
  func.func @transform_4(%arg0: i32) -> (i32, i32, i32) {
    %c0_i32 = arith.constant 0 : i32
    %c0_i32_0 = arith.constant 0 : i32
    %c0_i32_1 = arith.constant 0 : i32
    return %arg0, %c0_i32, %c0_i32_0 : i32, i32, i32
  }
}

</mosaic_0001>

<bundles_post_ra>
// kernel: tpu_custom_call.1
= control target key start
LH: loop header
LB: loop body
LE: loop exit
PB: predicated region body
PF: predicated region fallthrough
CT: control target
= control target key end

     0   :  { %9 = vsyncpa [#allocation3], 0  ;;  %s4044_s0 = inlined_call_operand.vmem [shape: f32[16,6], index: 0, kind: input, shape index: {}]   ;;  %s4045_s1 = inlined_call_operand.vmem [shape: f32[16,6], index: 1, kind: input, shape index: {}]   ;;  %s4046_s2 = inlined_call_operand.hbm [shape: f32[8,16,16], index: 2, kind: input, shape index: {}]   ;;  %s4047_s3 = inlined_call_operand.hbm [shape: f32[8,16,16], index: 3, kind: input, shape index: {}]   ;;  %s4048_s4 = inlined_call_operand.vmem [shape: f32[2,1,1], index: 4, kind: output, shape index: {}]  }
   0x1   :  { %11 = vsyncpa [#allocation3 + $0x1], 0 }
   0x2   :  { %12 = vsyncpa [#allocation5], 0 }
   0x3   :  { %14 = vsyncpa [#allocation5 + $0x1], 0  ;;  %s3287_s15 = smov 0   ;;  %s3289_s16 = smov 0  }
   0x4   :  { %s3291_s17 = smov 0   ;;  %s3293_s18 = smov 0  }
   0x5 LB: > { %s3306_s19 = sadd.s32 4294967295, %s3252_s18   ;;  %s3309_s20 = sadd.s32 1, %s3252_s18   ;;  %s3252_s18 = sphi %s3293_s18, %s4099_s18   ;;  %s3248_s17 = sphi %s3291_s17, %s4098_s17   ;;  %s3244_s16 = sphi %s3289_s16, %s4097_s16   ;;  %s3240_s15 = sphi %s3287_s15, %s4096_s15  }
   0x6   : > { %s66_s21 = ssub.s32 %s3252_s18, %s3309_s20  ;;  %s69_s22 = sadd.s32 1, %s3248_s17 }
   0x7   : > { %p67_p0 = scmp.eq.s32.totalorder %s66_s21, 0  ;;  %p76_p1 = scmp.ne.s32.totalorder %s3248_s17, %s3244_s16 }
   0x8   : > { %p77_p2 = scmp.eq.s32.totalorder %s3252_s18, 0  ;;  %p82_p3 = scmp.ne.s32.totalorder %s3244_s16, %s3240_s15 }
   0x9   : > { %s3319_s23 = scalar_select %p67_p0, %s3248_s17, %s69_s22  }
   0xa   : > { %p78_p4 = por %p77_p2, %p76_p1  ;;  %p83_p5 = scmp.eq.s32.totalorder %s3306_s19, 0 }
   0xb   : > { %p3091_p6 = scmp.lt.s32.totalorder %s3252_s18, 2  ;;  %s3328_s25 = sand.u32 1, %s3248_s17  }
   0xc   : > { %p3323_p7 = por %p83_p5, %p82_p3  ;;  %s2825_s26 = sshll.u32 %s3328_s25, 6 }
   0xd   : > { %s2894_s27 = sshll.u32 %s3252_s18, 10  ;;  %s168_s5 = scalar_lea.vmem [#allocation2], %s2825_s26 }
   0xe   : > { %s4059_s24 = scalar_select %p3323_p7, 1, 0 }
   0xf   : > { %s3337_s30 = scalar_lea.hbm %s4046_s2, %s2894_s27  ;;  %s176_s6 = sshll.u32 %s168_s5, 4  ;;  %s3341_s6 = int_to_ptr.vmem [resolvable:$true] %s176_s6 }
  0x10   : > { %p3343_p8 = pnand %p3091_p6, %p78_p4  ;;  %s165_s8 = scalar_lea.sflag [#allocation3], %s3328_s25 }
  0x11   : > { %s3154_s9 = scalar_lea.hbm %s3337_s30, 1024  ;;  %s3159_s12 = scalar_lea.hbm %s4046_s2, 2048 }
  0x12   : > { %p3155_p10 = scmp.ne.s32.totalorder %s3337_s30, %s3154_s9  ;;  %p3156_p11 = pneg %p3343_p8 }
  0x13   : > { %p3160_p0 = scmp.lt.u32.totalorder %s3337_s30, %s4046_s2  ;;  %p3161_p1 = scmp.lt.u32.totalorder %s3159_s12, %s3154_s9 }
  0x14   : > { %p3157_p12 = pnand %p3156_p11, %p3155_p10  ;;  %p3163_p3 = scmp.lt.u32.totalorder %s3154_s9, %s3337_s30 }
  0x15   : > { %p3162_p2 = por %p3161_p1, %p3160_p0 }
  0x16   : > { %p3158_p13 = pneg %p3157_p12 }
  0x17   : > { %p3164_p4 = por %p3163_p3, %p3162_p2 }
  0x19   : > { %p3165_p5 = pnand %p3164_p4, %p3158_p13 }
  0x1b   : > { %3168 = shalt.err (!%p3165_p5)
}
  0x1c   : > { %s3169_s15 = scalar_lea.vmem %s3341_s6, 1024  ;;  %s3254_s21 = smov [#allocation2]  }
  0x1d   : > { %p3170_p6 = scmp.ne.s32.totalorder %s3341_s6, %s3169_s15  ;;  %s3174_s22 = sshll.u32 %s3254_s21, 4  ;;  %s3175_s22 = int_to_ptr.vmem [resolvable:$false] %s3174_s22 }
  0x1e   : > { %s3176_s28 = scalar_lea.vmem %s3175_s22, 2048  ;;  %p3177_p9 = scmp.lt.s32.totalorder %s3341_s6, %s3175_s22 }
  0x1f   : > { %p3172_p10 = pnand %p3170_p6, %p3156_p11  ;;  %p3178_p0 = scmp.lt.s32.totalorder %s3176_s28, %s3169_s15 }
  0x21   : > { %p3173_p12 = pneg %p3172_p10  ;;  %p3179_p1 = por %p3178_p0, %p3177_p9 }
  0x23   : > { %p3180_p2 = pnand %p3179_p1, %p3173_p12 }
  0x25   : > { %3183 = shalt.err (!%p3180_p2)
}
  0x26   : > { %s3255_s29 = smov 128   ;;  %s3256_s5 = smov 8  }
  0x27   : > { %3087 = dma.hbm_to_vmem [thread:$0]  (!%p3343_p8), %s3337_s30, 1024, %s3341_s6, %s165_s8, %s3255_s29, %s3255_s29, %s3256_s5  }
  0x28   : > { %p206_p9 = scmp.lt.s32.totalorder %s3252_s18, 3  ;;  %s3385_s11 = scalar_lea.hbm %s4047_s3, %s2894_s27 }
  0x29   : > { %p4061_p13 = scmp.ge.s32.totalorder %s3252_s18, 1  ;;  %s190_s13 = scalar_lea.vmem [#allocation4], %s2825_s26 }
  0x2a   : > { %s198_s14 = sshll.u32 %s190_s13, 4  ;;  %s187_s30 = scalar_lea.sflag [#allocation5], %s3328_s25  ;;  %s3395_s14 = int_to_ptr.vmem [resolvable:$true] %s198_s14 }
  0x2b   : > { %p3389_p3 = pnand %p4061_p13, %p206_p9  ;;  %s3184_s6 = scalar_lea.hbm %s3385_s11, 1024 }
  0x2c   : > { %p3185_p4 = scmp.ne.s32.totalorder %s3385_s11, %s3184_s6  ;;  %s3189_s8 = scalar_lea.hbm %s4047_s3, 2048 }
  0x2d   : > { %p3190_p10 = scmp.lt.u32.totalorder %s3385_s11, %s4047_s3  ;;  %p3191_p12 = scmp.lt.u32.totalorder %s3189_s8, %s3184_s6 }
  0x2e   : > { %p3187_p5 = pnand %p3185_p4, %p3156_p11  ;;  %p3193_p1 = scmp.lt.u32.totalorder %s3184_s6, %s3385_s11 }
  0x2f   : > { %p3192_p0 = por %p3191_p12, %p3190_p10 }
  0x30   : > { %p3188_p6 = pneg %p3187_p5 }
  0x31   : > { %p3194_p2 = por %p3193_p1, %p3192_p0 }
  0x33   : > { %p3195_p9 = pnand %p3194_p2, %p3188_p6 }
  0x35   : > { %3198 = shalt.err (!%p3195_p9)
}
  0x36   : > { %s3199_s26 = scalar_lea.vmem %s3395_s14, 1024  ;;  %s3257_s22 = smov [#allocation4]  }
  0x37   : > { %p3200_p13 = scmp.ne.s32.totalorder %s3395_s14, %s3199_s26  ;;  %s3204_s28 = sshll.u32 %s3257_s22, 4  ;;  %s3205_s28 = int_to_ptr.vmem [resolvable:$false] %s3204_s28 }
  0x38   : > { %s3206_s9 = scalar_lea.vmem %s3205_s28, 2048  ;;  %p3207_p7 = scmp.lt.s32.totalorder %s3395_s14, %s3205_s28 }
  0x39   : > { %p3202_p4 = pnand %p3200_p13, %p3156_p11  ;;  %p3208_p10 = scmp.lt.s32.totalorder %s3206_s9, %s3199_s26 }
  0x3b   : > { %p3203_p5 = pneg %p3202_p4  ;;  %p3209_p12 = por %p3208_p10, %p3207_p7 }
  0x3d   : > { %p3210_p0 = pnand %p3209_p12, %p3203_p5 }
  0x3f   : > { %3213 = shalt.err (!%p3210_p0)
}
  0x40   : > { %3090 = dma.hbm_to_vmem [thread:$0]  (!%p3343_p8), %s3385_s11, 1024, %s3395_s14, %s187_s30, %s3255_s29, %s3255_s29, %s3256_s5  }
  0x41   : > { %210 = sbr.rel (%p3389_p3) target bundleno = 964 (0x3c4), region = 36 }
  0x48   : > { %s212_s10 = sand.u32 1, %s3244_s16   ;;  %p4063_p7 = scmp.ne.s32.totalorder %s4059_s24, 0 }
  0x49   : > { %s2834_s13 = sshll.u32 %s212_s10, 6  ;;  %s213_s6 = scalar_lea.sflag [#allocation3], %s212_s10 }
  0x4a   : > { %s3429_s18 = scalar_lea.vmem [#allocation2], %s2834_s13 }
  0x4b   : > { %3231 = dma.done.wait (%p4063_p7), %s213_s6, 1024  }
  0x4c   : > { %3233 = vsyncadd (%p4063_p7), %s213_s6, 4294966272  ;;  %s222_s25 = scalar_lea.sflag [#allocation5], %s212_s10  ;;  %s3435_s7 = scalar_lea.vmem [#allocation4], %s2834_s13 }
  0x4d   : > { %3235 = dma.done.wait (%p4063_p7), %s222_s25, 1024  }
  0x4e   : > { %3237 = vsyncadd (%p4063_p7), %s222_s25, 4294966272  ;;  %vm300_vm0 = vcmask 130048   ;;  %v298_v0 = vld [vmem:[%s4045_s1] sm:$0xff]  ;;  %v299_v1 = vld [vmem:[%s4045_s1 + $0x8] sm:$0xff]  ;;  %v3258_v58 = vmov 0.0|0.0   ;;  %vm3259_vm1 = vmmov 0  }
  0x4f   : > { %v3448_v2 = vld [vmem:[%s3429_s18] sm:$0xff]  ;;  %v3069_v3 = vpack.c.bf16 %v299_v1, %v298_v0  ;;  %v3453_v4 = vld [vmem:[%s3429_s18 + $0x8] sm:$0xff]  ;;  %v3456_v5 = vld [vmem:[%s3429_s18 + $0x10] sm:$0xff]  ;;  %v3260_v61 = vmov 0.0   ;;  %vm2719_vm2 = vcmask 46080   ;;  %p255_p8 = scmp.lt.s32.totalorder %s3306_s19, 1 }
  0x50   : > { %2960 = vmatprep.mubr.msk.f32.mxu0 %vm300_vm0, %v3448_v2  ;;  %v262_v6 = vld [vmem:[%s3429_s18 + $0x20] sm:$0xff]  ;;  %v263_v7 = vld [vmem:[%s3429_s18 + $0x28] sm:$0xff]  ;;  %v264_v9 = vld [vmem:[%s3429_s18 + $0x30] sm:$0xff]  ;;  %v274_v23 = vmul.f32 %v3448_v2, %v3448_v2  ;;  %v275_v24 = vmul.f32 %v3453_v4, %v3453_v4  ;;  %v276_v25 = vmul.f32 %v3456_v5, %v3456_v5  ;;  %vm2738_vm3 = vcmask 0  }
  0x51   : > { %3070 = vmatprep.subr.bf16.mxu0 %v3069_v3  ;;  %3076 = vmatprep.subr.bf16.mxu1 %v3069_v3  ;;  %v271_v8 = vld [vmem:[%s3435_s7 + $0x28] sm:$0xff]  ;;  %v270_v10 = vld [vmem:[%s3435_s7 + $0x20] sm:$0xff]  ;;  %v272_v12 = vld [vmem:[%s3435_s7 + $0x30] sm:$0xff]  ;;  %v278_v27 = vmul.f32 %v262_v6, %v262_v6  ;;  %v279_v28 = vmul.f32 %v263_v7, %v263_v7  ;;  %v280_v29 = vmul.f32 %v264_v9, %v264_v9  ;;  %s4101_s19 = smov (!%p255_p8, %s3306_s19), 1 }
  0x52   : > { %3072 = vmatpush3.bf16.msra.mxu0 %v3069_v3  ;;  %3077 = vmatpush3.bf16.msra.mxu1 %v3069_v3  ;;  %v295_v11 = vmul.f32 %v271_v8, %v263_v7  ;;  %v3469_v13 = vld [vmem:[%s3429_s18 + $0x18] sm:$0xff]  ;;  %v296_v14 = vmul.f32 %v272_v12, %v264_v9  ;;  %v294_v15 = vmul.f32 %v270_v10, %v262_v6  ;;  %v266_v19 = vld [vmem:[%s3435_s7] sm:$0xff]  ;;  %v267_v20 = vld [vmem:[%s3435_s7 + $0x8] sm:$0xff]  ;;  %s257_s21 = scalar_lea.vmem %s4048_s4, %s4101_s19 }
  0x53   : > { %v265_v16 = vld [vmem:[%s3429_s18 + $0x38] sm:$0xff]  ;;  %v268_v21 = vld [vmem:[%s3435_s7 + $0x10] sm:$0xff]  ;;  %v277_v26 = vmul.f32 %v3469_v13, %v3469_v13  ;;  %v282_v31 = vmul.f32 %v266_v19, %v266_v19  ;;  %v283_v32 = vmul.f32 %v267_v20, %v267_v20  ;;  %v286_v35 = vmul.f32 %v270_v10, %v270_v10  ;;  %v1666_v55 = vld [vmem:[%s4044_s0] sm:$0xff]  ;;  %3073 = vmatprep.subr.bf16.mxu1 %v3258_v58 }
  0x54   : > { %v273_v17 = vld [vmem:[%s3435_s7 + $0x38] sm:$0xff]  ;;  %3014 = vmatprep.mubr.msk.f32.mxu1 %vm300_vm0, %v294_v15  ;;  %v281_v30 = vmul.f32 %v265_v16, %v265_v16  ;;  %v284_v33 = vmul.f32 %v268_v21, %v268_v21  ;;  %v287_v36 = vmul.f32 %v271_v8, %v271_v8  ;;  %v288_v37 = vmul.f32 %v272_v12, %v272_v12  ;;  %v1667_v56 = vld [vmem:[%s4044_s0 + $0x8] sm:$0xff] }
  0x55   : > { %2961 = vmatmul.mubr.msk.f32.vlgmr.msra.gmra.mrb[0].mxu0 %vm300_vm0, %v3453_v4  ;;  %v297_v18 = vmul.f32 %v273_v17, %v265_v16  ;;  %3015 = vmatmul.mubr.msk.f32.vlgmr.msra.gmra.mrb[0].mxu1 %vm300_vm0, %v295_v11  ;;  %v269_v22 = vld [vmem:[%s3435_s7 + $0x18] sm:$0xff]  ;;  %v289_v38 = vmul.f32 %v273_v17, %v273_v17  ;;  %v290_v39 = vmul.f32 %v266_v19, %v3448_v2 }
  0x56   : > { %2963 = vmatprep.mubr.msk.f32.mxu0 %vm300_vm0, %v3456_v5  ;;  %3017 = vmatprep.mubr.msk.f32.mxu1 %vm300_vm0, %v296_v14  ;;  %v285_v34 = vmul.f32 %v269_v22, %v269_v22  ;;  %v291_v40 = vmul.f32 %v267_v20, %v3453_v4  ;;  %v292_v41 = vmul.f32 %v268_v21, %v3456_v5 }
  0x57   : > { %v293_v42 = vmul.f32 %v269_v22, %v3469_v13  ;;  %v3074_v57 = vpack.c.bf16 %v1667_v56, %v1666_v55 }
  0x59   : > { %2964 = vmatmul.mubr.msk.f32.gmra.mrb[2].mxu0 %vm300_vm0, %v3469_v13  ;;  %3018 = vmatmul.mubr.msk.f32.gmra.mrb[2].mxu1 %vm300_vm0, %v297_v18 }
  0x5a   : > { %2966 = vmatprep.mubr.msk.f32.mxu0 %vm300_vm0, %v262_v6  ;;  %3075 = vmatpush3.bf16.msra.mxu1 %v3074_v57 }
  0x5b   : > { %3024 = vmatprep.mubr.msk.f32.mxu1 %vm3259_vm1, %v3260_v61 }
  0x5d   : > { %2967 = vmatmul.mubr.msk.f32.gmra.mrb[4].mxu0 %vm300_vm0, %v263_v7 }
  0x5e   : > { %2969 = vmatprep.mubr.msk.f32.mxu0 %vm300_vm0, %v264_v9 }
  0x61   : > { %2970 = vmatmul.mubr.msk.f32.gmra.mrb[6].mxu0 %vm300_vm0, %v265_v16 }
  0x62   : > { %2972 = vmatprep.mubr.msk.f32.mxu0 %vm300_vm0, %v266_v19 }
  0x65   : > { %2973 = vmatmul.mubr.msk.f32.gmra.mrb[8].mxu0 %vm300_vm0, %v267_v20 }
  0x66   : > { %2975 = vmatprep.mubr.msk.f32.mxu0 %vm300_vm0, %v268_v21 }
  0x69   : > { %2976 = vmatmul.mubr.msk.f32.gmra.mrb[10].mxu0 %vm300_vm0, %v269_v22 }
  0x6a   : > { %2978 = vmatprep.mubr.msk.f32.mxu0 %vm300_vm0, %v270_v10 }
  0x6d   : > { %2979 = vmatmul.mubr.msk.f32.gmra.mrb[12].mxu0 %vm300_vm0, %v271_v8 }
  0x6e   : > { %2981 = vmatprep.mubr.msk.f32.mxu0 %vm300_vm0, %v272_v12 }
  0x71   : > { %2982 = vmatmul.mubr.msk.f32.gmra.mrb[14].mxu0 %vm300_vm0, %v273_v17 }
  0x72   : > { %2984 = vmatprep.mubr.msk.f32.mxu0 %vm300_vm0, %v274_v23 }
  0x75   : > { %2985 = vmatmul.mubr.msk.f32.gmra.mrb[16].mxu0 %vm300_vm0, %v275_v24  ;;  %v3261_v24 = vmov 1983009808  }
  0x76   : > { %2987 = vmatprep.mubr.msk.f32.mxu0 %vm300_vm0, %v276_v25  ;;  %v1348_v25 = vunpack.c.l.s4 %v3261_v24 }
  0x79   : > { %2988 = vmatmul.mubr.msk.f32.gmra.mrb[18].mxu0 %vm300_vm0, %v277_v26  ;;  %v1350_v26 = vlaneseq }
  0x7a   : > { %2990 = vmatprep.mubr.msk.f32.mxu0 %vm300_vm0, %v278_v27  ;;  %v1349_v27 = vunpack.c.0.s8 %v1348_v25 }
  0x7d   : > { %2991 = vmatmul.mubr.msk.f32.gmra.mrb[20].mxu0 %vm300_vm0, %v279_v28  ;;  %v1351_v28 = vshrl.u32 %v1350_v26, 7 }
  0x7e   : > { %2993 = vmatprep.mubr.msk.f32.mxu0 %vm300_vm0, %v280_v29 }
  0x7f   : > { %v3547_v29 = vsub.s32 %v1349_v27, %v1351_v28 }
  0x81   : > { %2994 = vmatmul.mubr.msk.f32.gmra.mrb[22].mxu0 %vm300_vm0, %v281_v30 }
  0x82   : > { %2996 = vmatprep.mubr.msk.f32.mxu0 %vm300_vm0, %v282_v31 }
  0x85   : > { %2997 = vmatmul.mubr.msk.f32.gmra.mrb[24].mxu0 %vm300_vm0, %v283_v32 }
  0x86   : > { %2999 = vmatprep.mubr.msk.f32.mxu0 %vm300_vm0, %v284_v33 }
  0x89   : > { %3000 = vmatmul.mubr.msk.f32.gmra.mrb[26].mxu0 %vm300_vm0, %v285_v34 }
  0x8a   : > { %3002 = vmatprep.mubr.msk.f32.mxu0 %vm300_vm0, %v286_v35 }
  0x8d   : > { %3003 = vmatmul.mubr.msk.f32.gmra.mrb[28].mxu0 %vm300_vm0, %v287_v36 }
  0x8e   : > { %3005 = vmatprep.mubr.msk.f32.mxu0 %vm300_vm0, %v288_v37 }
  0x91   : > { %3006 = vmatmul.mubr.msk.f32.gmra.mrb[30].mxu0 %vm300_vm0, %v289_v38 }
  0x92   : > { %3008 = vmatprep.mubr.msk.f32.mxu0 %vm300_vm0, %v290_v39 }
  0x95   : > { %3009 = vmatmul.mubr.msk.f32.gmra.mrb[32].mxu0 %vm300_vm0, %v291_v40 }
  0x96   : > { %3011 = vmatprep.mubr.msk.f32.mxu0 %vm300_vm0, %v292_v41 }
  0x99   : > { %3012 = vmatmul.mubr.msk.f32.gmra.mrb[34].mxu0 %vm300_vm0, %v293_v42 }
 0x128   : > { %v2962_v43 = vpop.f32.mrb[0].mxu0  ;;  %v3527_v46 = vpop.f32.mrb[0].mxu1 }
 0x129   : > { %v487_v44 = vpop.f32.mrb[1].mxu0  ;;  %v3529_v48 = vpop.f32.mrb[1].mxu1 }
 0x12a   : > { %686 = vxpose.xlu0.b32.start [1/2] (short) (narrow) %v487_v44, 8 }
 0x12c   : > { %v2965_v45 = vpop.f32.mrb[2].mxu0  ;;  %v3531_v50 = vpop.f32.mrb[2].mxu1 }
 0x12d   : > { %v497_v47 = vpop.f32.mrb[3].mxu0  ;;  %v3533_v52 = vpop.f32.mrb[3].mxu1 }
 0x12e   : > { %687 = vxpose.xlu0.b32.end [2/2] (short) (narrow) %v2962_v43, 8  ;;  %718 = vxpose.xlu1.b32.start [1/2] (short) (narrow) %v497_v47, 8 }
 0x130   : > { %v2968_v49 = vpop.f32.mrb[4].mxu0 }
 0x131   : > { %v507_v51 = vpop.f32.mrb[5].mxu0 }
 0x132   : > { %719 = vxpose.xlu1.b32.end [2/2] (short) (narrow) %v2965_v45, 8  ;;  %750 = vxpose.xlu0.b32.start [1/2] (short) (narrow) %v507_v51, 8 }
 0x134   : > { %v2971_v53 = vpop.f32.mrb[6].mxu0 }
 0x135   : > { %v517_v54 = vpop.f32.mrb[7].mxu0 }
 0x136   : > { %751 = vxpose.xlu0.b32.end [2/2] (short) (narrow) %v2968_v49, 8  ;;  %782 = vxpose.xlu1.b32.start [1/2] (short) (narrow) %v517_v54, 8 }
 0x138   : > { %v2974_v59 = vpop.f32.mrb[8].mxu0 }
 0x139   : > { %v527_v60 = vpop.f32.mrb[9].mxu0 }
 0x13a   : > { %783 = vxpose.xlu1.b32.end [2/2] (short) (narrow) %v2971_v53, 8  ;;  %814 = vxpose.xlu0.b32.start [1/2] (short) (narrow) %v527_v60, 8 }
 0x13c   : > { %v2977_v62 = vpop.f32.mrb[10].mxu0 }
 0x13d   : > { %v537_v63 = vpop.f32.mrb[11].mxu0 }
 0x13e   : > { %815 = vxpose.xlu0.b32.end [2/2] (short) (narrow) %v2974_v59, 8  ;;  %846 = vxpose.xlu1.b32.start [1/2] (short) (narrow) %v537_v63, 8 }
 0x140   : > { %v2980_v0 = vpop.f32.mrb[12].mxu0 }
 0x141   : > { %v547_v1 = vpop.f32.mrb[13].mxu0 }
 0x142   : > { %847 = vxpose.xlu1.b32.end [2/2] (short) (narrow) %v2977_v62, 8  ;;  %878 = vxpose.xlu0.b32.start [1/2] (short) (narrow) %v547_v1, 8 }
 0x144   : > { %v2983_v2 = vpop.f32.mrb[14].mxu0 }
 0x145   : > { %v557_v3 = vpop.f32.mrb[15].mxu0 }
 0x146   : > { %879 = vxpose.xlu0.b32.end [2/2] (short) (narrow) %v2980_v0, 8  ;;  %910 = vxpose.xlu1.b32.start [1/2] (short) (narrow) %v557_v3, 8 }
 0x148   : > { %v2986_v4 = vpop.f32.mrb[16].mxu0 }
 0x149   : > { %v567_v5 = vpop.f32.mrb[17].mxu0 }
 0x14a   : > { %911 = vxpose.xlu1.b32.end [2/2] (short) (narrow) %v2983_v2, 8  ;;  %942 = vxpose.xlu0.b32.start [1/2] (short) (narrow) %v567_v5, 8 }
 0x14c   : > { %v2989_v6 = vpop.f32.mrb[18].mxu0 }
 0x14d   : > { %v577_v7 = vpop.f32.mrb[19].mxu0 }
 0x14e   : > { %943 = vxpose.xlu0.b32.end [2/2] (short) (narrow) %v2986_v4, 8  ;;  %974 = vxpose.xlu1.b32.start [1/2] (short) (narrow) %v577_v7, 8 }
 0x150   : > { %v2992_v8 = vpop.f32.mrb[20].mxu0 }
 0x151   : > { %v587_v9 = vpop.f32.mrb[21].mxu0 }
 0x152   : > { %975 = vxpose.xlu1.b32.end [2/2] (short) (narrow) %v2989_v6, 8  ;;  %1006 = vxpose.xlu0.b32.start [1/2] (short) (narrow) %v587_v9, 8 }
 0x154   : > { %v2995_v10 = vpop.f32.mrb[22].mxu0 }
 0x155   : > { %v597_v11 = vpop.f32.mrb[23].mxu0 }
 0x156   : > { %1007 = vxpose.xlu0.b32.end [2/2] (short) (narrow) %v2992_v8, 8  ;;  %1038 = vxpose.xlu1.b32.start [1/2] (short) (narrow) %v597_v11, 8 }
 0x158   : > { %v2998_v12 = vpop.f32.mrb[24].mxu0 }
 0x159   : > { %v607_v13 = vpop.f32.mrb[25].mxu0 }
 0x15a   : > { %1039 = vxpose.xlu1.b32.end [2/2] (short) (narrow) %v2995_v10, 8  ;;  %1070 = vxpose.xlu0.b32.start [1/2] (short) (narrow) %v607_v13, 8 }
 0x15c   : > { %v3001_v14 = vpop.f32.mrb[26].mxu0 }
 0x15d   : > { %v617_v15 = vpop.f32.mrb[27].mxu0 }
 0x15e   : > { %1071 = vxpose.xlu0.b32.end [2/2] (short) (narrow) %v2998_v12, 8  ;;  %1102 = vxpose.xlu1.b32.start [1/2] (short) (narrow) %v617_v15, 8 }
 0x160   : > { %v3004_v16 = vpop.f32.mrb[28].mxu0 }
 0x161   : > { %v627_v17 = vpop.f32.mrb[29].mxu0 }
 0x162   : > { %1103 = vxpose.xlu1.b32.end [2/2] (short) (narrow) %v3001_v14, 8  ;;  %1134 = vxpose.xlu0.b32.start [1/2] (short) (narrow) %v627_v17, 8 }
 0x164   : > { %v3007_v18 = vpop.f32.mrb[30].mxu0 }
 0x165   : > { %v637_v19 = vpop.f32.mrb[31].mxu0 }
 0x166   : > { %1135 = vxpose.xlu0.b32.end [2/2] (short) (narrow) %v3004_v16, 8  ;;  %1166 = vxpose.xlu1.b32.start [1/2] (short) (narrow) %v637_v19, 8 }
 0x168   : > { %v3010_v20 = vpop.f32.mrb[32].mxu0 }
 0x169   : > { %v647_v21 = vpop.f32.mrb[33].mxu0 }
 0x16a   : > { %1167 = vxpose.xlu1.b32.end [2/2] (short) (narrow) %v3007_v18, 8  ;;  %1198 = vxpose.xlu0.b32.start [1/2] (short) (narrow) %v647_v21, 8 }
 0x16c   : > { %v3013_v22 = vpop.f32.mrb[34].mxu0 }
 0x16d   : > { %v657_v23 = vpop.f32.mrb[35].mxu0 }
 0x16e   : > { %1199 = vxpose.xlu0.b32.end [2/2] (short) (narrow) %v3010_v20, 8  ;;  %1230 = vxpose.xlu1.b32.start [1/2] (short) (narrow) %v657_v23, 8 }
 0x172   : > { %1262 = vxpose.xlu0.b32.start [1/2] (short) (narrow) %v3529_v48, 8  ;;  %1231 = vxpose.xlu1.b32.end [2/2] (short) (narrow) %v3013_v22, 8 }
 0x176   : > { %1263 = vxpose.xlu0.b32.end [2/2] (short) (narrow) %v3527_v46, 8  ;;  %1294 = vxpose.xlu1.b32.start [1/2] (short) (narrow) %v3533_v52, 8 }
 0x17a   : > { %1295 = vxpose.xlu1.b32.end [2/2] (short) (narrow) %v3531_v50, 8 }
 0x1aa   : > { %v702_v30 = vpop.trf.xlu0 }
 0x1ab   : > { %v1346_v31 = vcombine.high %v702_v30, %v702_v30  ;;  %v1353_v32 = vrot.slane %v702_v30, %v3547_v29 }
 0x1ad   : > { %v1360_v33 = vrot.slane %v1346_v31, %v3547_v29  ;;  %v1361_v34 = vcombine.high %v1353_v32, %v1353_v32 }
 0x1ae   : > { %v734_v35 = vpop.trf.xlu1 }
 0x1af   : > { %v1668_v36 = vcombine.low %v1353_v32, %v1361_v34  ;;  %v1362_v37 = vcombine.high %v734_v35, %v734_v35  ;;  %v1369_v38 = vrot.slane %v734_v35, %v3547_v29 }
 0x1b1   : > { %v1676_v39 = vrot.slane %v1668_v36, %v3547_v29  ;;  %v1376_v40 = vrot.slane %v1362_v37, %v3547_v29  ;;  %v1377_v41 = vcombine.high %v1369_v38, %v1369_v38  ;;  %v1669_v42 = vcombine.low %v1360_v33, %v1369_v38 }
 0x1b2   : > { %v766_v43 = vpop.trf.xlu0 }
 0x1b3   : > { %v1683_v44 = vrot.slane %v1669_v42, %v3547_v29  ;;  %v1378_v45 = vcombine.high %v766_v43, %v766_v43  ;;  %v1385_v46 = vrot.slane %v766_v43, %v3547_v29  ;;  %v1685_v47 = vcombine.low %v1377_v41, %v1376_v40 }
 0x1b5   : > { %v1684_v48 = vcombine.low %v1676_v39, %v1683_v44  ;;  %v1392_v49 = vrot.slane %v1378_v45, %v3547_v29  ;;  %v1393_v50 = vcombine.high %v1385_v46, %v1385_v46  ;;  %v1693_v55 = vrot.slane %v1685_v47, %v3547_v29 }
 0x1b6   : > { %v798_v51 = vpop.trf.xlu1 }
 0x1b7   : > { %v1686_v52 = vcombine.low %v1385_v46, %v1393_v50  ;;  %v1394_v53 = vcombine.high %v798_v51, %v798_v51  ;;  %v1401_v54 = vrot.slane %v798_v51, %v3547_v29  ;;  %3025 = vmatmul.mubr.msk.f32.vlgmr.msra.gmra.mrb[4].mxu1 %vm300_vm0, %v1684_v48 }
 0x1b8   : > { %3027 = vmatprep.mubr.msk.f32.mxu1 %vm3259_vm1, %v3260_v61 }
 0x1b9   : > { %v1700_v56 = vrot.slane %v1686_v52, %v3547_v29  ;;  %v1408_v57 = vrot.slane %v1394_v53, %v3547_v29  ;;  %v1409_v58 = vcombine.high %v1401_v54, %v1401_v54  ;;  %v1702_v59 = vcombine.low %v1392_v49, %v1401_v54 }
 0x1ba   : > { %v830_v60 = vpop.trf.xlu0 }
 0x1bb   : > { %v1703_v62 = vcombine.low %v1409_v58, %v1408_v57  ;;  %v1710_v63 = vrot.slane %v1702_v59, %v3547_v29  ;;  %v1410_v0 = vcombine.high %v830_v60, %v830_v60  ;;  %v1417_v1 = vrot.slane %v830_v60, %v3547_v29 }
 0x1bc   : > { %v1701_v2 = vcombine.low %v1693_v55, %v1700_v56 }
 0x1bd   : > { %v1717_v3 = vrot.slane %v1703_v62, %v3547_v29  ;;  %v1424_v4 = vrot.slane %v1410_v0, %v3547_v29  ;;  %v1425_v5 = vcombine.high %v1417_v1, %v1417_v1 }
 0x1be   : > { %v862_v6 = vpop.trf.xlu1  ;;  %3028 = vmatmul.mubr.msk.f32.gmra.mrb[6].mxu1 %vm300_vm0, %v1701_v2 }
 0x1bf   : > { %v1719_v7 = vcombine.low %v1417_v1, %v1425_v5  ;;  %v1426_v8 = vcombine.high %v862_v6, %v862_v6  ;;  %v1433_v9 = vrot.slane %v862_v6, %v3547_v29  ;;  %3030 = vmatprep.mubr.msk.f32.mxu1 %vm3259_vm1, %v3260_v61  ;;  %v1718_v10 = vcombine.low %v1710_v63, %v1717_v3 }
 0x1c1   : > { %v1727_v11 = vrot.slane %v1719_v7, %v3547_v29  ;;  %v1440_v12 = vrot.slane %v1426_v8, %v3547_v29  ;;  %v1441_v13 = vcombine.high %v1433_v9, %v1433_v9  ;;  %v1720_v14 = vcombine.low %v1424_v4, %v1433_v9 }
 0x1c2   : > { %v894_v15 = vpop.trf.xlu0  ;;  %3031 = vmatmul.mubr.msk.f32.gmra.mrb[8].mxu1 %vm300_vm0, %v1718_v10 }
 0x1c3   : > { %v1734_v16 = vrot.slane %v1720_v14, %v3547_v29  ;;  %v1442_v17 = vcombine.high %v894_v15, %v894_v15  ;;  %v1449_v18 = vrot.slane %v894_v15, %v3547_v29  ;;  %3033 = vmatprep.mubr.msk.f32.mxu1 %vm3259_vm1, %v3260_v61  ;;  %v1736_v19 = vcombine.low %v1441_v13, %v1440_v12 }
 0x1c5   : > { %v1456_v20 = vrot.slane %v1442_v17, %v3547_v29  ;;  %v1457_v21 = vcombine.high %v1449_v18, %v1449_v18  ;;  %v1735_v22 = vcombine.low %v1727_v11, %v1734_v16  ;;  %v1744_v27 = vrot.slane %v1736_v19, %v3547_v29 }
 0x1c6   : > { %v926_v23 = vpop.trf.xlu1 }
 0x1c7   : > { %v1737_v24 = vcombine.low %v1449_v18, %v1457_v21  ;;  %v1458_v25 = vcombine.high %v926_v23, %v926_v23  ;;  %v1465_v26 = vrot.slane %v926_v23, %v3547_v29  ;;  %3034 = vmatmul.mubr.msk.f32.gmra.mrb[10].mxu1 %vm300_vm0, %v1735_v22 }
 0x1c8   : > { %3036 = vmatprep.mubr.msk.f32.mxu1 %vm3259_vm1, %v3260_v61 }
 0x1c9   : > { %v1751_v28 = vrot.slane %v1737_v24, %v3547_v29  ;;  %v1472_v30 = vrot.slane %v1458_v25, %v3547_v29  ;;  %v1473_v31 = vcombine.high %v1465_v26, %v1465_v26  ;;  %v1753_v32 = vcombine.low %v1456_v20, %v1465_v26 }
 0x1ca   : > { %v958_v33 = vpop.trf.xlu0 }
 0x1cb   : > { %v1754_v34 = vcombine.low %v1473_v31, %v1472_v30  ;;  %v1761_v35 = vrot.slane %v1753_v32, %v3547_v29  ;;  %v1474_v36 = vcombine.high %v958_v33, %v958_v33  ;;  %v1481_v37 = vrot.slane %v958_v33, %v3547_v29 }
 0x1cc   : > { %v1752_v38 = vcombine.low %v1744_v27, %v1751_v28 }
 0x1cd   : > { %v1768_v39 = vrot.slane %v1754_v34, %v3547_v29  ;;  %v1488_v40 = vrot.slane %v1474_v36, %v3547_v29  ;;  %v1489_v41 = vcombine.high %v1481_v37, %v1481_v37 }
 0x1ce   : > { %3037 = vmatmul.mubr.msk.f32.gmra.mrb[12].mxu1 %vm300_vm0, %v1752_v38  ;;  %v990_v42 = vpop.trf.xlu1 }
 0x1cf   : > { %v1770_v43 = vcombine.low %v1481_v37, %v1489_v41  ;;  %v1490_v44 = vcombine.high %v990_v42, %v990_v42  ;;  %v1497_v45 = vrot.slane %v990_v42, %v3547_v29  ;;  %3039 = vmatprep.mubr.msk.f32.mxu1 %vm3259_vm1, %v3260_v61  ;;  %v1769_v46 = vcombine.low %v1761_v35, %v1768_v39 }
 0x1d1   : > { %v1778_v47 = vrot.slane %v1770_v43, %v3547_v29  ;;  %v1504_v48 = vrot.slane %v1490_v44, %v3547_v29  ;;  %v1505_v49 = vcombine.high %v1497_v45, %v1497_v45  ;;  %v1771_v50 = vcombine.low %v1488_v40, %v1497_v45 }
 0x1d2   : > { %3040 = vmatmul.mubr.msk.f32.gmra.mrb[14].mxu1 %vm300_vm0, %v1769_v46  ;;  %v1022_v51 = vpop.trf.xlu0 }
 0x1d3   : > { %v1785_v52 = vrot.slane %v1771_v50, %v3547_v29  ;;  %v1506_v53 = vcombine.high %v1022_v51, %v1022_v51  ;;  %v1513_v54 = vrot.slane %v1022_v51, %v3547_v29  ;;  %3042 = vmatprep.mubr.msk.f32.mxu1 %vm3259_vm1, %v3260_v61  ;;  %v1787_v55 = vcombine.low %v1505_v49, %v1504_v48 }
 0x1d5   : > { %v1520_v56 = vrot.slane %v1506_v53, %v3547_v29  ;;  %v1521_v57 = vcombine.high %v1513_v54, %v1513_v54  ;;  %v1786_v58 = vcombine.low %v1778_v47, %v1785_v52  ;;  %v1795_v0 = vrot.slane %v1787_v55, %v3547_v29 }
 0x1d6   : > { %v1054_v59 = vpop.trf.xlu1 }
 0x1d7   : > { %v1788_v60 = vcombine.low %v1513_v54, %v1521_v57  ;;  %v1522_v62 = vcombine.high %v1054_v59, %v1054_v59  ;;  %v1529_v63 = vrot.slane %v1054_v59, %v3547_v29  ;;  %3043 = vmatmul.mubr.msk.f32.gmra.mrb[16].mxu1 %vm300_vm0, %v1786_v58 }
 0x1d8   : > { %3045 = vmatprep.mubr.msk.f32.mxu1 %vm3259_vm1, %v3260_v61 }
 0x1d9   : > { %v1802_v1 = vrot.slane %v1788_v60, %v3547_v29  ;;  %v1536_v2 = vrot.slane %v1522_v62, %v3547_v29  ;;  %v1537_v3 = vcombine.high %v1529_v63, %v1529_v63  ;;  %v1804_v4 = vcombine.low %v1520_v56, %v1529_v63 }
 0x1da   : > { %v1086_v5 = vpop.trf.xlu0 }
 0x1db   : > { %v1805_v6 = vcombine.low %v1537_v3, %v1536_v2  ;;  %v1812_v7 = vrot.slane %v1804_v4, %v3547_v29  ;;  %v1538_v8 = vcombine.high %v1086_v5, %v1086_v5  ;;  %v1545_v9 = vrot.slane %v1086_v5, %v3547_v29 }
 0x1dc   : > { %v1803_v10 = vcombine.low %v1795_v0, %v1802_v1 }
 0x1dd   : > { %v1819_v11 = vrot.slane %v1805_v6, %v3547_v29  ;;  %v1552_v12 = vrot.slane %v1538_v8, %v3547_v29  ;;  %v1553_v13 = vcombine.high %v1545_v9, %v1545_v9 }
 0x1de   : > { %3046 = vmatmul.mubr.msk.f32.gmra.mrb[18].mxu1 %vm300_vm0, %v1803_v10  ;;  %v1118_v14 = vpop.trf.xlu1 }
 0x1df   : > { %v1821_v15 = vcombine.low %v1545_v9, %v1553_v13  ;;  %v1554_v16 = vcombine.high %v1118_v14, %v1118_v14  ;;  %v1561_v17 = vrot.slane %v1118_v14, %v3547_v29  ;;  %3048 = vmatprep.mubr.msk.f32.mxu1 %vm3259_vm1, %v3260_v61  ;;  %v1820_v18 = vcombine.low %v1812_v7, %v1819_v11 }
 0x1e1   : > { %v1829_v19 = vrot.slane %v1821_v15, %v3547_v29  ;;  %v1568_v20 = vrot.slane %v1554_v16, %v3547_v29  ;;  %v1569_v21 = vcombine.high %v1561_v17, %v1561_v17  ;;  %v1822_v22 = vcombine.low %v1552_v12, %v1561_v17 }
 0x1e2   : > { %3049 = vmatmul.mubr.msk.f32.gmra.mrb[20].mxu1 %vm300_vm0, %v1820_v18  ;;  %v1150_v23 = vpop.trf.xlu0 }
 0x1e3   : > { %v1836_v24 = vrot.slane %v1822_v22, %v3547_v29  ;;  %v1570_v25 = vcombine.high %v1150_v23, %v1150_v23  ;;  %v1577_v26 = vrot.slane %v1150_v23, %v3547_v29  ;;  %3051 = vmatprep.mubr.msk.f32.mxu1 %vm3259_vm1, %v3260_v61  ;;  %v1838_v27 = vcombine.low %v1569_v21, %v1568_v20 }
 0x1e5   : > { %v1584_v28 = vrot.slane %v1570_v25, %v3547_v29  ;;  %v1585_v30 = vcombine.high %v1577_v26, %v1577_v26  ;;  %v1837_v31 = vcombine.low %v1829_v19, %v1836_v24  ;;  %v1846_v36 = vrot.slane %v1838_v27, %v3547_v29 }
 0x1e6   : > { %v1182_v32 = vpop.trf.xlu1 }
 0x1e7   : > { %v1839_v33 = vcombine.low %v1577_v26, %v1585_v30  ;;  %v1586_v34 = vcombine.high %v1182_v32, %v1182_v32  ;;  %v1593_v35 = vrot.slane %v1182_v32, %v3547_v29  ;;  %3052 = vmatmul.mubr.msk.f32.gmra.mrb[22].mxu1 %vm300_vm0, %v1837_v31 }
 0x1e8   : > { %3054 = vmatprep.mubr.msk.f32.mxu1 %vm3259_vm1, %v3260_v61 }
 0x1e9   : > { %v1853_v37 = vrot.slane %v1839_v33, %v3547_v29  ;;  %v1600_v38 = vrot.slane %v1586_v34, %v3547_v29  ;;  %v1601_v39 = vcombine.high %v1593_v35, %v1593_v35  ;;  %v1855_v40 = vcombine.low %v1584_v28, %v1593_v35 }
 0x1ea   : > { %v1214_v41 = vpop.trf.xlu0 }
 0x1eb   : > { %v1856_v42 = vcombine.low %v1601_v39, %v1600_v38  ;;  %v1863_v43 = vrot.slane %v1855_v40, %v3547_v29  ;;  %v1602_v44 = vcombine.high %v1214_v41, %v1214_v41  ;;  %v1609_v45 = vrot.slane %v1214_v41, %v3547_v29 }
 0x1ec   : > { %v1854_v46 = vcombine.low %v1846_v36, %v1853_v37 }
 0x1ed   : > { %v1870_v47 = vrot.slane %v1856_v42, %v3547_v29  ;;  %v1616_v48 = vrot.slane %v1602_v44, %v3547_v29  ;;  %v1617_v49 = vcombine.high %v1609_v45, %v1609_v45 }
 0x1ee   : > { %3055 = vmatmul.mubr.msk.f32.gmra.mrb[24].mxu1 %vm300_vm0, %v1854_v46  ;;  %v1246_v50 = vpop.trf.xlu1 }
 0x1ef   : > { %v1872_v51 = vcombine.low %v1609_v45, %v1617_v49  ;;  %v1618_v52 = vcombine.high %v1246_v50, %v1246_v50  ;;  %v1625_v53 = vrot.slane %v1246_v50, %v3547_v29  ;;  %3057 = vmatprep.mubr.msk.f32.mxu1 %vm3259_vm1, %v3260_v61  ;;  %v1871_v54 = vcombine.low %v1863_v43, %v1870_v47 }
 0x1f1   : > { %v1880_v55 = vrot.slane %v1872_v51, %v3547_v29  ;;  %v1632_v56 = vrot.slane %v1618_v52, %v3547_v29  ;;  %v1633_v57 = vcombine.high %v1625_v53, %v1625_v53  ;;  %v1873_v58 = vcombine.low %v1616_v48, %v1625_v53 }
 0x1f2   : > { %3058 = vmatmul.mubr.msk.f32.gmra.mrb[26].mxu1 %vm300_vm0, %v1871_v54  ;;  %v1278_v59 = vpop.trf.xlu0 }
 0x1f3   : > { %v1887_v60 = vrot.slane %v1873_v58, %v3547_v29  ;;  %v1634_v62 = vcombine.high %v1278_v59, %v1278_v59  ;;  %v1641_v63 = vrot.slane %v1278_v59, %v3547_v29  ;;  %3060 = vmatprep.mubr.msk.f32.mxu1 %vm3259_vm1, %v3260_v61  ;;  %v1889_v0 = vcombine.low %v1633_v57, %v1632_v56 }
 0x1f5   : > { %v1649_v1 = vcombine.high %v1641_v63, %v1641_v63  ;;  %v1888_v2 = vcombine.low %v1880_v55, %v1887_v60  ;;  %v1648_v4 = vrot.slane %v1634_v62, %v3547_v29  ;;  %v1897_v8 = vrot.slane %v1889_v0, %v3547_v29 }
 0x1f6   : > { %v1310_v3 = vpop.trf.xlu1 }
 0x1f7   : > { %v1890_v5 = vcombine.low %v1641_v63, %v1649_v1  ;;  %v1650_v6 = vcombine.high %v1310_v3, %v1310_v3  ;;  %v1657_v7 = vrot.slane %v1310_v3, %v3547_v29  ;;  %3061 = vmatmul.mubr.msk.f32.gmra.mrb[28].mxu1 %vm300_vm0, %v1888_v2 }
 0x1f8   : > { %3063 = vmatprep.mubr.msk.f32.mxu1 %vm3259_vm1, %v3260_v61 }
 0x1f9   : > { %v1904_v9 = vrot.slane %v1890_v5, %v3547_v29  ;;  %v1664_v10 = vrot.slane %v1650_v6, %v3547_v29  ;;  %v1665_v11 = vcombine.high %v1657_v7, %v1657_v7  ;;  %v1906_v12 = vcombine.low %v1648_v4, %v1657_v7 }
 0x1fb   : > { %v1907_v13 = vcombine.low %v1665_v11, %v1664_v10  ;;  %v1905_v14 = vcombine.low %v1897_v8, %v1904_v9  ;;  %v1914_v15 = vrot.slane %v1906_v12, %v3547_v29 }
 0x1fd   : > { %v1921_v16 = vrot.slane %v1907_v13, %v3547_v29  ;;  %3064 = vmatmul.mubr.msk.f32.gmra.mrb[30].mxu1 %vm300_vm0, %v1905_v14 }
 0x1fe   : > { %3066 = vmatprep.mubr.msk.f32.mxu1 %vm3259_vm1, %v3260_v61 }
 0x1ff   : > { %v1922_v17 = vcombine.low %v1914_v15, %v1921_v16 }
 0x201   : > { %3067 = vmatmul.mubr.msk.f32.gmra.mrb[32].mxu1 %vm300_vm0, %v1922_v17 }
 0x28a   : > { %v2019_v18 = vpop.f32.mrb[4].mxu1 }
 0x28b   : > { %v3026_v19 = vpop.f32.mrb[5].mxu1  ;;  %v2108_v21 = vcombine.high %v2019_v18, %v2019_v18  ;;  %v2115_v23 = vrot.slane %v2019_v18, %v3547_v29 }
 0x28d   : > { %v2122_v25 = vrot.slane %v2108_v21, %v3547_v29  ;;  %v2123_v27 = vcombine.high %v2115_v23, %v2115_v23  ;;  %v3665_v34 = vmul.f32 %v2115_v23, %v2115_v23 }
 0x28f   : > { %v2124_v28 = vcombine.high %v2122_v25, %v2122_v25  ;;  %v3668_v36 = vmul.f32 %v2123_v27, %v2123_v27  ;;  %v3670_v37 = vmul.f32 %v2122_v25, %v2122_v25 }
 0x291   : > { %v2024_v20 = vpop.f32.mrb[6].mxu1  ;;  %v3680_v44 = vmul.f32 %v2124_v28, %v2124_v28 }
 0x292   : > { %v3029_v22 = vpop.f32.mrb[7].mxu1  ;;  %v2125_v30 = vcombine.high %v2024_v20, %v2024_v20  ;;  %v2132_v35 = vrot.slane %v2024_v20, %v3547_v29 }
 0x294   : > { %v3678_v42 = vrot.slane %v2125_v30, %v3547_v29  ;;  %v2140_v49 = vcombine.high %v2132_v35, %v2132_v35  ;;  %v3720_v3 = vmul.f32 %v2132_v35, %v2132_v35 }
 0x295   : > { %v2029_v24 = vpop.f32.mrb[8].mxu1 }
 0x296   : > { %v3032_v26 = vpop.f32.mrb[9].mxu1  ;;  %v2142_v43 = vcombine.high %v2029_v24, %v2029_v24  ;;  %v3695_v52 = vrot.slane %v2029_v24, %v3547_v29  ;;  %v2141_v62 = vcombine.high %v3678_v42, %v3678_v42  ;;  %v3726_v7 = vmul.f32 %v2140_v49, %v2140_v49 }
 0x297   : > { %v3730_v8 = vmul.f32 %v3678_v42, %v3678_v42 }
 0x298   : > { %v3713_v63 = vrot.slane %v2142_v43, %v3547_v29  ;;  %v2157_v5 = vcombine.high %v3695_v52, %v3695_v52  ;;  %v3739_v16 = vmul.f32 %v2141_v62, %v2141_v62 }
 0x29a   : > { %v2034_v31 = vpop.f32.mrb[10].mxu1  ;;  %v2158_v15 = vcombine.high %v3713_v63, %v3713_v63 }
 0x29b   : > { %v2159_v32 = vcombine.high %v2034_v31, %v2034_v31  ;;  %v2166_v61 = vrot.slane %v2034_v31, %v3547_v29  ;;  %v3035_v33 = vpop.f32.mrb[11].mxu1 }
 0x29d   : > { %v2173_v38 = vrot.slane %v2159_v32, %v3547_v29  ;;  %v2174_v39 = vcombine.high %v2166_v61, %v2166_v61  ;;  %v3673_v40 = vmul.f32 %v2166_v61, %v2166_v61  ;;  %v3675_v41 = vmul.f32 %v2166_v61, %v2115_v23 }
 0x29e   : > { %v3754_v23 = vmul.f32 %v3695_v52, %v3695_v52 }
 0x29f   : > { %4064 = vst [vmem:[#allocation8_spill] sm:$0xff] %v3675_v41  ;;  %v2175_v45 = vcombine.high %v2173_v38, %v2173_v38  ;;  %v3682_v46 = vmul.f32 %v2174_v39, %v2174_v39  ;;  %v3684_v47 = vmul.f32 %v2173_v38, %v2173_v38  ;;  %v3688_v48 = vadd.f32 %v3673_v40, %v3665_v34 }
 0x2a0   : > { %v3690_v50 = vmul.f32 %v2174_v39, %v2123_v27  ;;  %v3692_v51 = vmul.f32 %v2173_v38, %v2122_v25  ;;  %v3775_v39 = vmul.f32 %v2158_v15, %v2158_v15 }
 0x2a1   : > { %v2039_v53 = vpop.f32.mrb[12].mxu1  ;;  %v3697_v54 = vmul.f32 %v2175_v45, %v2175_v45  ;;  %v3701_v55 = vadd.f32 %v3682_v46, %v3668_v36  ;;  %v3705_v56 = vadd.f32 %v3684_v47, %v3670_v37  ;;  %v3708_v60 = vmul.f32 %v2175_v45, %v2124_v28 }
 0x2a2   : > { %v2176_v57 = vcombine.high %v2039_v53, %v2039_v53  ;;  %v2183_v58 = vrot.slane %v2039_v53, %v3547_v29  ;;  %v3038_v59 = vpop.f32.mrb[13].mxu1  ;;  %v3760_v28 = vmul.f32 %v2157_v5, %v2157_v5 }
 0x2a3   : > { %v3717_v0 = vadd.f32 %v3697_v54, %v3680_v44  ;;  %v3806_v59 = vadd.f32 0.0001, %v3688_v48 }
 0x2a4   : > { %v2190_v1 = vrot.slane %v2176_v57, %v3547_v29  ;;  %v2191_v2 = vcombine.high %v2183_v58, %v2183_v58  ;;  %v3722_v4 = vmul.f32 %v2183_v58, %v2183_v58  ;;  %v3732_v9 = vmul.f32 %v2183_v58, %v2132_v35 }
 0x2a5   : > { %v2044_v6 = vpop.f32.mrb[14].mxu1  ;;  %v3771_v35 = vmul.f32 %v3713_v63, %v3713_v63 }
 0x2a6   : > { %4065 = vst [vmem:[#allocation9_spill] sm:$0xff] %v3732_v9  ;;  %v2192_v10 = vcombine.high %v2190_v1, %v2190_v1  ;;  %v2193_v11 = vcombine.high %v2044_v6, %v2044_v6  ;;  %v2200_v12 = vrot.slane %v2044_v6, %v3547_v29  ;;  %v3041_v13 = vpop.f32.mrb[15].mxu1  ;;  %v3735_v14 = vmul.f32 %v2191_v2, %v2191_v2 }
 0x2a7   : > { %v3741_v17 = vmul.f32 %v2190_v1, %v2190_v1  ;;  %v2559_v18 = vadd.f32 %v3722_v4, %v3720_v3  ;;  %v3796_v13 = vmul.f32 %v2191_v2, %v2140_v49 }
 0x2a8   : > { %v2207_v19 = vrot.slane %v2193_v11, %v3547_v29  ;;  %v2208_v20 = vcombine.high %v2200_v12, %v2200_v12  ;;  %v3746_v21 = vmul.f32 %v2192_v10, %v2192_v10  ;;  %v3750_v22 = vadd.f32 %v3735_v14, %v3726_v7 }
 0x2a9   : > { %v2561_v24 = vadd.f32 %v3741_v17, %v3730_v8  ;;  %v3758_v25 = vmul.f32 %v2200_v12, %v2200_v12  ;;  %4070 = vst [vmem:[#allocation14_spill] sm:$0xff] %v3796_v13 }
 0x2aa   : > { %v2209_v26 = vcombine.high %v2207_v19, %v2207_v19  ;;  %v2049_v27 = vpop.f32.mrb[16].mxu1  ;;  %v2562_v30 = vadd.f32 %v3746_v21, %v3739_v16  ;;  %v3764_v31 = vmul.f32 %v2208_v20, %v2208_v20  ;;  %v3773_v38 = vmul.f32 %v2207_v19, %v2207_v19 }
 0x2ab   : > { %4066 = vst [vmem:[#allocation10_spill] sm:$0xff] %v3758_v25  ;;  %v2210_v32 = vcombine.high %v2049_v27, %v2049_v27  ;;  %v3767_v61 = vrot.slane %v2049_v27, %v3547_v29  ;;  %v3044_v33 = vpop.f32.mrb[17].mxu1  ;;  %v2563_v45 = vadd.f32 %v3758_v25, %v3754_v23 }
 0x2ac   : > { %4067 = vst [vmem:[#allocation11_spill] sm:$0xff] %v3764_v31  ;;  %4068 = vst [vmem:[#allocation12_spill] sm:$0xff] %v3773_v38  ;;  %v3777_v43 = vmul.f32 %v2209_v26, %v2209_v26  ;;  %v2564_v53 = vadd.f32 %v3764_v31, %v3760_v28  ;;  %v2565_v6 = vadd.f32 %v3773_v38, %v3771_v35  ;;  %v2495_v38 = vmul.f32 2.0, %v3675_v41 }
 0x2ad   : > { %v3784_v57 = vrot.slane %v2210_v32, %v3547_v29  ;;  %v2225_v58 = vcombine.high %v3767_v61, %v3767_v61  ;;  %v3810_v31 = vmul.f32 %v2190_v1, %v3678_v42  ;;  %v3821_v33 = vmul.f32 %v2208_v20, %v2157_v5 }
 0x2ae   : > { %4069 = vst [vmem:[#allocation13_spill] sm:$0xff] %v3777_v43  ;;  %v3794_v11 = vadd.f32 %v3777_v43, %v3775_v39  ;;  %v3812_v43 = vmul.f32 %v2192_v10, %v2141_v62  ;;  %v3827_v42 = vadd.f32 0.0001, %v3701_v55  ;;  %v3830_v62 = vadd.f32 0.0001, %v3705_v56 }
 0x2af   : > { %v2226_v27 = vcombine.high %v3784_v57, %v3784_v57  ;;  %v3801_v32 = vsub.f32 %v2225_v58, %v3668_v36  ;;  %4071 = vst [vmem:[#allocation15_spill] sm:$0xff] %v3810_v31  ;;  %v2496_v36 = vmul.f32 2.0, %v3690_v50  ;;  %v3819_v58 = vmul.f32 %v2200_v12, %v3695_v52 }
 0x2b0   : > { %4072 = vst [vmem:[#allocation16_spill] sm:$0xff] %v3812_v43  ;;  %v2498_v1 = vmul.f32 2.0, %v3708_v60  ;;  %v3835_v52 = vmul.f32 %v2207_v19, %v3713_v63  ;;  %v3837_v5 = vmul.f32 %v2209_v26, %v2158_v15  ;;  %v3847_v56 = vadd.f32 0.0001, %v3717_v0 }
 0x2b1   : > { %v3815_v49 = vsub.f32 %v2226_v27, %v3680_v44  ;;  %v2054_v2 = vpop.f32.mrb[18].mxu1  ;;  %v2497_v44 = vmul.f32 2.0, %v3692_v51  ;;  %v3849_v20 = vadd.f32 0.0001, %v2495_v38  ;;  %v3851_v27 = vadd.f32 0.0001, %v2496_v36 }
 0x2b2   : > { %v2227_v48 = vcombine.high %v2054_v2, %v2054_v2  ;;  %v3824_v25 = vrot.slane %v2054_v2, %v3547_v29  ;;  %v3047_v41 = vpop.f32.mrb[19].mxu1  ;;  %v3863_v0 = vadd.f32 0.0001, %v2559_v18  ;;  %v3867_v36 = vadd.f32 0.0001, %v2498_v1 }
 0x2b3   : > { %4073 = vst [vmem:[#allocation17_spill] sm:$0xff] %v3849_v20  ;;  %4074 = vst [vmem:[#allocation18_spill] sm:$0xff] %v3851_v27  ;;  %v3865_v38 = vadd.f32 0.0001, %v2497_v44  ;;  %v3878_v19 = vadd.f32 0.0001, %v2561_v24 }
 0x2b4   : > { %v3840_v10 = vrot.slane %v2227_v48, %v3547_v29  ;;  %v2242_v41 = vcombine.high %v3824_v25, %v3824_v25  ;;  %4076 = vst [vmem:[#allocation20_spill] sm:$0xff] %v3867_v36  ;;  %v3884_v44 = vadd.f32 0.0001, %v2562_v30  ;;  %v3886_v1 = vadd.f32 0.0001, %v2563_v45 }
 0x2b5   : > { %v2059_v12 = vpop.f32.mrb[20].mxu1  ;;  %4075 = vst [vmem:[#allocation19_spill] sm:$0xff] %v3865_v38  ;;  %v2499_v24 = vmul.f32 2.0, %v3732_v9  ;;  %v3898_v45 = vadd.f32 0.0001, %v2564_v53  ;;  %v2502_v20 = vmul.f32 2.0, %v3812_v43 }
 0x2b6   : > { %v2243_v63 = vcombine.high %v3840_v10, %v3840_v10  ;;  %v3856_v15 = vsub.f32 %v2242_v41, %v3726_v7  ;;  %v2244_v26 = vcombine.high %v2059_v12, %v2059_v12  ;;  %v3050_v2 = vpop.f32.mrb[21].mxu1  ;;  %v3861_v48 = vrot.slane %v2059_v12, %v3547_v29 }
 0x2b7   : > { %v3876_v41 = vadd.f32 0.0001, %v3750_v22  ;;  %v3903_v38 = vadd.f32 0.0001, %v2565_v6 }
 0x2b8   : > { %v3870_v55 = vsub.f32 %v2243_v63, %v3739_v16  ;;  %v3873_v7 = vrot.slane %v2244_v26, %v3547_v29  ;;  %v2259_v12 = vcombine.high %v3861_v48, %v3861_v48  ;;  %v2500_v26 = vmul.f32 2.0, %v3796_v13 }
 0x2b9   : > { %v2501_v63 = vmul.f32 2.0, %v3810_v31 }
 0x2ba   : > { %v2260_v16 = vcombine.high %v3873_v7, %v3873_v7  ;;  %v2064_v22 = vpop.f32.mrb[22].mxu1  ;;  %v3895_v2 = vsub.f32 %v2259_v12, %v3760_v28  ;;  %v3910_v12 = vadd.f32 0.0001, %v3794_v11  ;;  %v3914_v53 = vadd.f32 0.0001, %v2500_v26 }
 0x2bb   : > { %v2261_v36 = vcombine.high %v2064_v22, %v2064_v22  ;;  %v2268_v30 = vrot.slane %v2064_v22, %v3547_v29  ;;  %v3053_v18 = vpop.f32.mrb[23].mxu1  ;;  %v3922_v31 = vadd.f32 0.0001, %v2501_v63  ;;  %v2504_v11 = vmul.f32 2.0, %v3821_v33 }
 0x2bc   : > { %v3901_v27 = vsub.f32 %v2260_v16, %v3775_v39  ;;  %v3912_v18 = vadd.f32 0.0001, %v2499_v24  ;;  %v2503_v39 = vmul.f32 2.0, %v3819_v58  ;;  %v3928_v24 = vmul.f32 2.0, %v3835_v52 }
 0x2bd   : > { %v2275_v13 = vrot.slane %v2261_v36, %v3547_v29  ;;  %v2276_v9 = vcombine.high %v2268_v30, %v2268_v30  ;;  %v2471_v28 = vsub.f32 %v2268_v30, %v3673_v40  ;;  %v4077_v36 = vsub.f32 %v3767_v61, %v3665_v34 }
 0x2be   : > { %v3924_v40 = vadd.f32 0.0001, %v2502_v20  ;;  %v3937_v63 = vmul.f32 2.0, %v3837_v5 }
 0x2bf   : > { %v2277_v6 = vcombine.high %v2275_v13, %v2275_v13  ;;  %v2472_v16 = vsub.f32 %v2276_v9, %v3682_v46  ;;  %v2473_v22 = vsub.f32 %v2275_v13, %v3684_v47  ;;  %v2579_v43 = vadd.f32 %v2471_v28, %v4077_v36 }
 0x2c0   : > { %v4078_v46 = vsub.f32 %v3784_v57, %v3670_v37  ;;  %v3939_v28 = vadd.f32 0.0001, %v2503_v39 }
 0x2c1   : > { %v2474_v26 = vsub.f32 %v2277_v6, %v3697_v54  ;;  %v2580_v30 = vadd.f32 %v2472_v16, %v3801_v32  ;;  %v2591_v9 = vadd.f32 0.0009, %v2579_v43  ;;  %v2069_v34 = vpop.f32.mrb[24].mxu1  ;;  %v3945_v16 = vadd.f32 0.0001, %v2504_v11 }
 0x2c2   : > { %v2581_v47 = vadd.f32 %v2473_v22, %v4078_v46  ;;  %v2278_v61 = vcombine.high %v2069_v34, %v2069_v34  ;;  %v2285_v13 = vrot.slane %v2069_v34, %v3547_v29  ;;  %v3056_v20 = vpop.f32.mrb[25].mxu1 }
 0x2c3   : > { %v2582_v36 = vadd.f32 %v2474_v26, %v3815_v49  ;;  %v2592_v54 = vadd.f32 0.0009, %v2580_v30  ;;  %v2603_v32 = vmul.f32 %v2591_v9, %v3806_v59  ;;  %v4079_v59 = vsub.f32 %v3824_v25, %v3720_v3 }
 0x2c4   : > { %v2593_v6 = vadd.f32 0.0009, %v2581_v47  ;;  %v2292_v37 = vrot.slane %v2278_v61, %v3547_v29  ;;  %v2293_v57 = vcombine.high %v2285_v13, %v2285_v13  ;;  %v2475_v43 = vsub.f32 %v2285_v13, %v3722_v4 }
 0x2c5   : > { %v2594_v22 = vadd.f32 0.0009, %v2582_v36  ;;  %v2604_v46 = vmul.f32 %v2592_v54, %v3827_v42  ;;  %3130 = vrcp.f32 %v2603_v32  ;;  %v2074_v39 = vpop.f32.mrb[26].mxu1  ;;  %v4081_v54 = vld [vmem:[#allocation10_spill] sm:$0xff] }
 0x2c6   : > { %v2605_v34 = vmul.f32 %v2593_v6, %v3830_v62  ;;  %v2294_v20 = vcombine.high %v2292_v37, %v2292_v37  ;;  %v2476_v49 = vsub.f32 %v2293_v57, %v3735_v14  ;;  %v2477_v26 = vsub.f32 %v2292_v37, %v3741_v17  ;;  %v3059_v47 = vpop.f32.mrb[27].mxu1 }
 0x2c7   : > { %v2583_v30 = vadd.f32 %v2475_v43, %v4079_v59  ;;  %v2606_v4 = vmul.f32 %v2594_v22, %v3847_v56  ;;  %3132 = vrcp.f32 %v2604_v46  ;;  %v2295_v11 = vcombine.high %v2074_v39, %v2074_v39  ;;  %v4083_v43 = vld [vmem:[#allocation12_spill] sm:$0xff] }
 0x2c8   : > { %v2302_v42 = vrot.slane %v2074_v39, %v3547_v29  ;;  %3134 = vrcp.f32 %v2605_v34  ;;  %v2478_v62 = vsub.f32 %v2294_v20, %v3746_v21  ;;  %v2584_v9 = vadd.f32 %v2476_v49, %v3856_v15  ;;  %v4082_v15 = vld [vmem:[#allocation11_spill] sm:$0xff]  ;;  %v4085_v20 = vld [vmem:[#allocation13_spill] sm:$0xff] }
 0x2c9   : > { %v4080_v14 = vsub.f32 %v3840_v10, %v3730_v8  ;;  %3136 = vrcp.f32 %v2606_v4  ;;  %v2595_v61 = vadd.f32 0.0009, %v2583_v30  ;;  %v2309_v3 = vrot.slane %v2295_v11, %v3547_v29 }
 0x2ca   : > { %v2310_v25 = vcombine.high %v2302_v42, %v2302_v42  ;;  %v2586_v56 = vadd.f32 %v2478_v62, %v3870_v55  ;;  %v2596_v13 = vadd.f32 0.0009, %v2584_v9  ;;  %v2479_v6 = vsub.f32 %v2302_v42, %v4081_v54  ;;  %v2079_v32 = vpop.f32.mrb[28].mxu1 }
 0x2cb   : > { %v2585_v17 = vadd.f32 %v2477_v26, %v4080_v14  ;;  %v2607_v21 = vmul.f32 %v2595_v61, %v3863_v0  ;;  %v2311_v37 = vcombine.high %v2309_v3, %v2309_v3  ;;  %v2481_v8 = vsub.f32 %v2309_v3, %v4083_v43  ;;  %v3062_v10 = vpop.f32.mrb[29].mxu1 }
 0x2cc   : > { %v2480_v57 = vsub.f32 %v2310_v25, %v4082_v15  ;;  %v2598_v22 = vadd.f32 0.0009, %v2586_v56  ;;  %v2608_v46 = vmul.f32 %v2596_v13, %v3876_v41  ;;  %v4084_v55 = vsub.f32 %v3861_v48, %v3754_v23  ;;  %v4087_v25 = vld [vmem:[#allocation8_spill] sm:$0xff]  ;;  %v4088_v10 = vld [vmem:[#allocation9_spill] sm:$0xff] }
 0x2cd   : > { %v2597_v36 = vadd.f32 0.0009, %v2585_v17  ;;  %3138 = vrcp.f32 %v2607_v21  ;;  %v2482_v49 = vsub.f32 %v2311_v37, %v4085_v20  ;;  %v4086_v26 = vsub.f32 %v3873_v7, %v3771_v35 }
 0x2ce   : > { %v2587_v39 = vadd.f32 %v2479_v6, %v4084_v55  ;;  %v2588_v0 = vadd.f32 %v2480_v57, %v3895_v2  ;;  %v2610_v30 = vmul.f32 %v2598_v22, %v3884_v44  ;;  %3140 = vrcp.f32 %v2608_v46  ;;  %v4089_v55 = vld [vmem:[#allocation14_spill] sm:$0xff] }
 0x2cf   : > { %v2609_v34 = vmul.f32 %v2597_v36, %v3878_v19  ;;  %v2589_v59 = vadd.f32 %v2481_v8, %v4086_v26  ;;  %v2312_v41 = vcombine.high %v2079_v32, %v2079_v32  ;;  %v3131_v4 = vpop.eup %3130  ;;  %v2590_v19 = vadd.f32 %v2482_v49, %v3901_v27  ;;  %v4091_v26 = vld [vmem:[#allocation17_spill] sm:$0xff] }
 0x2d0   : > { %v2599_v47 = vadd.f32 0.0009, %v2587_v39  ;;  %v2600_v23 = vadd.f32 0.0009, %v2588_v0  ;;  %v2319_v2 = vrot.slane %v2079_v32, %v3547_v29  ;;  %v2084_v35 = vpop.f32.mrb[30].mxu1  ;;  %v4090_v39 = vld [vmem:[#allocation15_spill] sm:$0xff] }
 0x2d1   : > { %3142 = vrcp.f32 %v2609_v34  ;;  %v2601_v48 = vadd.f32 0.0009, %v2589_v59  ;;  %v2326_v42 = vrot.slane %v2312_v41, %v3547_v29  ;;  %v3133_v7 = vpop.eup %3132  ;;  %v2602_v62 = vadd.f32 0.0009, %v2590_v19  ;;  %v3065_v17 = vpop.f32.mrb[31].mxu1  ;;  %v4092_v41 = vld [vmem:[#allocation19_spill] sm:$0xff] }
 0x2d2   : > { %3144 = vrcp.f32 %v2610_v30  ;;  %v2611_v11 = vmul.f32 %v2599_v47, %v3886_v1  ;;  %v2612_v44 = vmul.f32 %v2600_v23, %v3898_v45  ;;  %v2329_v14 = vcombine.high %v2084_v35, %v2084_v35  ;;  %v3135_v61 = vpop.eup %3134  ;;  %v4093_v23 = vld [vmem:[#allocation16_spill] sm:$0xff] }
 0x2d3   : > { %v2613_v9 = vmul.f32 %v2601_v48, %v3903_v38  ;;  %v2327_v27 = vcombine.high %v2319_v2, %v2319_v2  ;;  %v2328_v3 = vcombine.high %v2326_v42, %v2326_v42  ;;  %v2483_v56 = vsub.f32 %v2319_v2, %v4087_v25  ;;  %v3137_v1 = vpop.eup %3136 }
 0x2d4   : > { %3146 = vrcp.f32 %v2611_v11  ;;  %v2614_v13 = vmul.f32 %v2602_v62, %v3910_v12  ;;  %v2485_v36 = vsub.f32 %v2326_v42, %v3692_v51  ;;  %v2336_v54 = vrot.slane %v2084_v35, %v3547_v29  ;;  %v2089_v32 = vpop.f32.mrb[32].mxu1  ;;  %v4094_v35 = vld [vmem:[#allocation18_spill] sm:$0xff] }
 0x2d5   : > { %3148 = vrcp.f32 %v2612_v44  ;;  %v2484_v45 = vsub.f32 %v2327_v27, %v3690_v50  ;;  %v2486_v38 = vsub.f32 %v2328_v3, %v3708_v60  ;;  %v2519_v6 = vmul.f32 2.0, %v2483_v56  ;;  %v3068_v57 = vpop.f32.mrb[33].mxu1  ;;  %v4095_v44 = vld [vmem:[#allocation20_spill] sm:$0xff] }
 0x2d6   : > { %3150 = vrcp.f32 %v2613_v9  ;;  %v2521_v21 = vmul.f32 2.0, %v2485_v36  ;;  %v2343_v37 = vrot.slane %v2329_v14, %v3547_v29  ;;  %v2344_v15 = vcombine.high %v2336_v54, %v2336_v54 }
 0x2d7   : > { %3152 = vrcp.f32 %v2614_v13  ;;  %v2520_v43 = vmul.f32 2.0, %v2484_v45  ;;  %v2522_v12 = vmul.f32 2.0, %v2486_v38  ;;  %v2531_v8 = vadd.f32 0.0009, %v2519_v6  ;;  %v3139_v22 = vpop.eup %3138 }
 0x2d8   : > { %v2487_v51 = vsub.f32 %v2336_v54, %v4088_v10  ;;  %v2533_v46 = vadd.f32 0.0009, %v2521_v21  ;;  %v2345_v34 = vcombine.high %v2343_v37, %v2343_v37  ;;  %v2488_v50 = vsub.f32 %v2344_v15, %v4089_v55  ;;  %v3141_v20 = vpop.eup %3140 }
 0x2d9   : > { %v2489_v60 = vsub.f32 %v2343_v37, %v4090_v39  ;;  %v2532_v49 = vadd.f32 0.0009, %v2520_v43  ;;  %v2534_v0 = vadd.f32 0.0009, %v2522_v12  ;;  %v2543_v59 = vmul.f32 %v2531_v8, %v4091_v26 }
 0x2da   : > { %v2523_v30 = vmul.f32 2.0, %v2487_v51  ;;  %v2545_v19 = vmul.f32 %v2533_v46, %v4092_v41  ;;  %v2490_v48 = vsub.f32 %v2345_v34, %v4093_v23  ;;  %v2524_v11 = vmul.f32 2.0, %v2488_v50 }
 0x2db   : > { %v3143_v47 = vpop.eup %3142  ;;  %v2525_v2 = vmul.f32 2.0, %v2489_v60  ;;  %v2544_v62 = vmul.f32 %v2532_v49, %v4094_v35  ;;  %v2546_v9 = vmul.f32 %v2534_v0, %v4095_v44  ;;  %v2627_v14 = vmul.f32 %v3131_v4, %v2543_v59 }
 0x2dc   : > { %v3145_v42 = vpop.eup %3144  ;;  %v2535_v17 = vadd.f32 0.0009, %v2523_v30  ;;  %v2629_v27 = vmul.f32 %v3135_v61, %v2545_v19  ;;  %v2526_v3 = vmul.f32 2.0, %v2490_v48  ;;  %v2536_v25 = vadd.f32 0.0009, %v2524_v11 }
 0x2dd   : > { %v2537_v56 = vadd.f32 0.0009, %v2525_v2  ;;  %v2628_v36 = vmul.f32 %v3133_v7, %v2544_v62  ;;  %v2630_v45 = vmul.f32 %v3137_v1, %v2546_v9  ;;  %v2346_v38 = vcombine.high %v2089_v32, %v2089_v32 }
 0x2de   : > { %v3147_v13 = vpop.eup %3146  ;;  %v2547_v54 = vmul.f32 %v2535_v17, %v3912_v18  ;;  %v2538_v21 = vadd.f32 0.0009, %v2526_v3  ;;  %v2548_v37 = vmul.f32 %v2536_v25, %v3914_v53  ;;  %v2353_v4 = vrot.slane %v2089_v32, %v3547_v29 }
 0x2df   : > { %v3149_v6 = vpop.eup %3148  ;;  %v2549_v15 = vmul.f32 %v2537_v56, %v3922_v31  ;;  %v2651_v43 = vcombine.low %v2627_v14, %v2628_v36  ;;  %v2360_v12 = vrot.slane %v2346_v38, %v3547_v29  ;;  %v2665_v8 = vrot.slane %v2629_v27, %v3547_v29 }
 0x2e0   : > { %v3151_v57 = vpop.eup %3150  ;;  %v2631_v61 = vmul.f32 %v3139_v22, %v2547_v54  ;;  %v2550_v18 = vmul.f32 %v2538_v21, %v3924_v40  ;;  %v2632_v1 = vmul.f32 %v3141_v20, %v2548_v37  ;;  %v2361_v51 = vcombine.high %v2353_v4, %v2353_v4 }
 0x2e1   : > { %v3153_v7 = vpop.eup %3152  ;;  %v2633_v10 = vmul.f32 %v3143_v47, %v2549_v15  ;;  %v2362_v34 = vcombine.high %v2360_v12, %v2360_v12  ;;  %v2491_v53 = vsub.f32 %v2353_v4, %v3819_v58  ;;  %v2493_v31 = vsub.f32 %v2360_v12, %v3835_v52 }
 0x2e2   : > { %v2667_v46 = vcombine.low %v2630_v45, %v2631_v61  ;;  %v2634_v32 = vmul.f32 %v3145_v42, %v2550_v18  ;;  %v2492_v55 = vsub.f32 %v2361_v51, %v3821_v33  ;;  %v2658_v22 = vrot.slane %v2651_v43, %v3547_v29 }
 0x2e3   : > { %v2681_v50 = vrot.slane %v2632_v1, %v3547_v29  ;;  %v2494_v39 = vsub.f32 %v2362_v34, %v3837_v5  ;;  %v2527_v60 = vmul.f32 2.0, %v2491_v53  ;;  %v2529_v40 = vmul.f32 2.0, %v2493_v31 }
 0x2e4   : > { %v2674_v20 = vrot.slane %v2667_v46, %v3547_v29  ;;  %v2517_v49 = vadd.f32 0.0001, %v3928_v24  ;;  %v2528_v0 = vmul.f32 2.0, %v2492_v55  ;;  %v2666_v26 = vcombine.low %v2658_v22, %v2665_v8 }
 0x2e5   : > { %v2683_v58 = vcombine.low %v2633_v10, %v2634_v32  ;;  %v2530_v59 = vmul.f32 2.0, %v2494_v39  ;;  %v2539_v52 = vadd.f32 0.0009, %v2527_v60  ;;  %v2541_v30 = vadd.f32 0.0009, %v2529_v40 }
 0x2e6   : > { %v2682_v47 = vcombine.low %v2674_v20, %v2681_v50  ;;  %v2518_v33 = vadd.f32 0.0001, %v3937_v63  ;;  %v2540_v41 = vadd.f32 0.0009, %v2528_v0  ;;  %v2720_v19 = vsel %vm2719_vm2, %v2666_v26, 0.0 }
 0x2e7   : > { %v2542_v23 = vadd.f32 0.0009, %v2530_v59  ;;  %v2551_v5 = vmul.f32 %v2539_v52, %v3939_v28  ;;  %v2553_v48 = vmul.f32 %v2541_v30, %v2517_v49  ;;  %v2690_v44 = vrot.slane %v2683_v58, %v3547_v29 }
 0x2e8   : > { %v2721_v11 = vsel %vm2719_vm2, %v2682_v47, 0.0  ;;  %v2552_v24 = vmul.f32 %v2540_v41, %v3945_v16 }
 0x2e9   : > { %v2722_v2 = vadd.f32 %v2721_v11, %v2720_v19  ;;  %v2554_v42 = vmul.f32 %v2542_v23, %v2518_v33  ;;  %v2635_v35 = vmul.f32 %v3147_v13, %v2551_v5  ;;  %v2637_v62 = vmul.f32 %v3151_v57, %v2553_v48 }
 0x2ea   : > { %v2636_v9 = vmul.f32 %v3149_v6, %v2552_v24 }
 0x2eb   : > { %v2638_v14 = vmul.f32 %v3153_v7, %v2554_v42  ;;  %v2697_v63 = vrot.slane %v2635_v35, %v3547_v29 }
 0x2ec   : > { %v2699_v17 = vcombine.low %v2636_v9, %v2637_v62 }
 0x2ed   : > { %v2698_v27 = vcombine.low %v2690_v44, %v2697_v63  ;;  %v2713_v3 = vrot.slane %v2638_v14, %v3547_v29 }
 0x2ee   : > { %v2706_v28 = vrot.slane %v2699_v17, %v3547_v29 }
 0x2ef   : > { %v2723_v25 = vsel %vm2719_vm2, %v2698_v27, 0.0 }
 0x2f0   : > { %v2714_v16 = vcombine.low %v2706_v28, %v2713_v3  ;;  %v2724_v56 = vadd.f32 %v2723_v25, %v2722_v2 }
 0x2f2   : > { %v2725_v13 = vsel %vm2719_vm2, %v2714_v16, 0.0 }
 0x2f3   : > { %v2726_v36 = vadd.f32 %v2725_v13, %v2724_v56 }
 0x2f5   : > { %v2727_v54 = vsel %vm2719_vm2, %v2726_v36, 0.0 }
 0x2f6   : > { %2728 = vadd.xlane.f32.xlu0 %v2727_v54 }
 0x383   : > { %v2729_v45 = vpop.xlane.xlu0 %2728 }
 0x384   : > { %v2730_v38 = vrot.slane %v2729_v45, 4 }
 0x386   : > { %v2731_v6 = vadd.f32 %v2730_v38, %v2729_v45 }
 0x388   : > { %v2732_v21 = vrot.slane %v2731_v6, 2 }
 0x38a   : > { %v2733_v37 = vadd.f32 %v2732_v21, %v2731_v6 }
 0x38c   : > { %v2734_v15 = vrot.slane %v2733_v37, 1 }
 0x38e   : > { %v2735_v4 = vadd.f32 %v2734_v15, %v2733_v37 }
 0x390   : > { %3078 = vpush %v2735_v4 }
 0x3c1   : > { %s3079_s26 = spop %3078 }
 0x3c2   : > { %v2737_v29 = vstv %s3079_s26 }
 0x3c3   : > { %2739 = vst.msk [vmem:[%s257_s21] sm:$0x1] %vm2738_vm3, %v2737_v29 }
 0x3c4 PF: > { %p17_p11 = scmp.ge.s32.totalorder %s3309_s20, 4   ;;  %s4096_s15 = smov %s3244_s16 }
 0x3c5   : > { %s4097_s16 = smov %s3248_s17  ;;  %s4098_s17 = smov %s3319_s23 }
 0x3c6   : > { %s4099_s18 = smov %s3309_s20  ;;  %19 = sbr.rel (!%p17_p11) target bundleno = 5 (0x5), region = 89 }
 0x3cd   :  { %2757 = vsyncpa [#allocation3], 1 }
 0x3ce   :  { %2759 = vsyncpa [#allocation3 + $0x1], 1 }
 0x3cf   :  { %2760 = vsyncpa [#allocation5], 1 }
 0x3d0   :  { %2762 = vsyncpa [#allocation5 + $0x1], 1 }

</bundles_post_ra>
